<compile_context>
chip_gen: v6e
topology: v6e:2x2x1
jax: 0.10.0
libtpu: 0.0.40
codegen_flags: <defaults>
</compile_context>

<pallas_src>
import functools

import jax
import jax.numpy as jnp
from jax.experimental import pallas as pl
from jax.experimental.pallas import tpu as pltpu


def _mlp_kernel(z_ref, w0_ref, b0_ref, w1_ref, b1_ref, w2_ref, b2_ref,
                wf_ref, bf_ref, o_ref, *, ew_dtype):
    """One batch-tile of the forward pass.

    MXU operands are in the weights' dtype (bf16), accumulation is f32;
    bias-add / ReLU run in `ew_dtype` (f32 on v5e, bf16 on v6e/v7x)."""
    compute_dtype = w0_ref.dtype

    def layer(h, w_ref, b_ref, relu):
        acc = jnp.dot(h, w_ref[...], preferred_element_type=jnp.float32)
        acc = acc.astype(ew_dtype) + b_ref[...]          # bias already ew_dtype
        if relu:
            acc = jnp.maximum(acc, 0.0)
        return acc

    h = layer(z_ref[...], w0_ref, b0_ref, relu=True)                 # layer 0 (fused concat input)
    h = layer(h.astype(compute_dtype), w1_ref, b1_ref, relu=True)    # hidden 1
    h = layer(h.astype(compute_dtype), w2_ref, b2_ref, relu=True)    # hidden 2
    out = layer(h.astype(compute_dtype), wf_ref, bf_ref, relu=False) # fc, no last activation
    o_ref[...] = out.astype(o_ref.dtype)


def prepare_params(params, *, compute_dtype=jnp.bfloat16, ew_dtype=jnp.float32):
    """One-time parameter prep (hoisted out of the per-call hot path):
    weights -> compute_dtype (MXU operands), biases -> (1, n) in ew_dtype."""
    w0, b0, w1, b1, w2, b2, wf, bf = params
    cw = lambda w: jnp.asarray(w, compute_dtype)
    cb = lambda b: jnp.asarray(b, ew_dtype).reshape(1, -1)
    return (cw(w0), cb(b0), cw(w1), cb(b1), cw(w2), cb(b2), cw(wf), cb(bf))


def _forward(x, obs, prepared, *, grid_steps, max_batch_tile, compute_dtype,
             ew_dtype):
    """Traced forward body (jit this). x: (B, input_dim), obs: (B, obs_dim)."""
    w0, b0, w1, b1, w2, b2, wf, bf = prepared
    B = x.shape[0]
    d_in = x.shape[1] + obs.shape[1]
    out_dim = wf.shape[1]
    out_dtype = x.dtype

    # Fuse the module's torch.cat on the (tiny) input side: a single
    # (B, input_dim+obs_dim) bf16 operand -> one contiguous DMA and one
    # K=d_in dot in layer 0. Under jit the concat/cast/pad fuse with dispatch.
    z = jnp.concatenate([x, obs], axis=1).astype(compute_dtype)

    # Static tile/grid selection. One step on single-TC chips; >=2 on v7x so
    # the "parallel" batch axis shards across both TensorCores. Sublane(8)
    # aligned, capped for very large batches.
    bt = pl.cdiv(B, grid_steps)
    bt = max(8, min(((bt + 7) // 8) * 8, max_batch_tile))
    grid_b = pl.cdiv(B, bt)
    pad_b = grid_b * bt
    if pad_b != B:
        z = jnp.pad(z, ((0, pad_b - B), (0, 0)))   # padded rows sliced off below

    def resident(arr):
        # Whole array, constant block index -> DMA'd once, resident in VMEM.
        return pl.BlockSpec(arr.shape, lambda i: (0, 0))

    kernel = functools.partial(_mlp_kernel, ew_dtype=ew_dtype)
    out = pl.pallas_call(
        kernel,
        out_shape=jax.ShapeDtypeStruct((pad_b, out_dim), out_dtype),
        grid_spec=pltpu.PrefetchScalarGridSpec(
            num_scalar_prefetch=0,
            grid=(grid_b,),
            in_specs=[
                pl.BlockSpec((bt, d_in), lambda i: (i, 0)),   # z batch tile
                resident(w0), resident(b0),
                resident(w1), resident(b1),
                resident(w2), resident(b2),
                resident(wf), resident(bf),
            ],
            out_specs=pl.BlockSpec((bt, out_dim), lambda i: (i, 0)),
        ),
        compiler_params=pltpu.CompilerParams(
            dimension_semantics=("parallel",)),   # batch shards across v7x TCs
    )(z, w0, b0, w1, b1, w2, b2, wf, bf)

    return out[:B] if pad_b != B else out


def _device_kind():
    try:
        return jax.devices()[0].device_kind.lower()
    except Exception:
        return ""


def make_conditional_encoder_mlp(params, *, compute_dtype=jnp.bfloat16,
                                 grid_steps=None, ew_dtype=None,
                                 max_batch_tile=4096):
    """Prepare params once and return a jitted forward(x, obs) callable."""
    kind = _device_kind()
    if grid_steps is None:
        # v7x: 2 TensorCores/chip -> keep >=2 grid steps; v5e/v6e: 1 TC -> 1 step.
        grid_steps = 2 if ("v7" in kind or "7x" in kind) else 1
    if ew_dtype is None:
        # bf16 VPU is native on v6e/v7x; v5e has no bf16 VALU -> keep f32 there.
        ew_dtype = jnp.bfloat16 if ("v6" in kind or "v7" in kind) else jnp.float32

    prepared = prepare_params(params, compute_dtype=compute_dtype,
                              ew_dtype=ew_dtype)
    fwd = jax.jit(functools.partial(
        _forward, grid_steps=grid_steps, max_batch_tile=max_batch_tile,
        compute_dtype=compute_dtype, ew_dtype=ew_dtype))
    return lambda x, obs: fwd(x, obs, prepared)


def init_params(key, input_dim, obs_dim, hidden_dim, output_dim):
    """Deterministic synthetic init. Weights are (in_features, out_features),
    i.e. transposed vs. nn.Linear.weight, so the kernel does `act @ W + b`."""
    # TODO(synk): torch's weights_init_encoder (xavier etc.) is host-side init,
    # not part of the forward pass; a simple normal init is used here instead.
    d_in = input_dim + obs_dim
    ks = jax.random.split(key, 5)
    scale = 0.05
    w0 = scale * jax.random.normal(ks[0], (d_in, hidden_dim), jnp.float32)
    b0 = jnp.zeros((hidden_dim,), jnp.float32)
    w1 = scale * jax.random.normal(ks[1], (hidden_dim, hidden_dim), jnp.float32)
    b1 = jnp.zeros((hidden_dim,), jnp.float32)
    w2 = scale * jax.random.normal(ks[2], (hidden_dim, hidden_dim), jnp.float32)
    b2 = jnp.zeros((hidden_dim,), jnp.float32)
    wf = scale * jax.random.normal(ks[3], (hidden_dim, output_dim), jnp.float32)
    bf = 0.01 * jax.random.normal(ks[4], (output_dim,), jnp.float32)
    return (w0, b0, w1, b1, w2, b2, wf, bf)


def _reference(x, obs, params):
    """Pure-JAX f32 reference matching the PyTorch module forward."""
    w0, b0, w1, b1, w2, b2, wf, bf = params
    z = jnp.concatenate([x, obs], axis=1)
    h = jnp.maximum(z @ w0 + b0.reshape(1, -1), 0.0)
    h = jnp.maximum(h @ w1 + b1.reshape(1, -1), 0.0)
    h = jnp.maximum(h @ w2 + b2.reshape(1, -1), 0.0)
    return h @ wf + bf.reshape(1, -1)


if __name__ == "__main__":
    # Small shapes consistent with the module (output_dim matches the module
    # default of 16; hidden kept small). B=500 exercises the pad-to-tile path.
    B, input_dim, obs_dim, hidden_dim, output_dim = 500, 10, 6, 128, 16

    key = jax.random.PRNGKey(0)
    kx, kobs, kp = jax.random.split(key, 3)
    x = jax.random.normal(kx, (B, input_dim), jnp.float32)
    obs = jax.random.normal(kobs, (B, obs_dim), jnp.float32)
    params = init_params(kp, input_dim, obs_dim, hidden_dim, output_dim)

    forward = make_conditional_encoder_mlp(params)
    out = jax.block_until_ready(forward(x, obs))

    ref = _reference(x, obs, params)
    assert out.shape == (B, output_dim)
    # bf16 matmul operands (f32 accumulation) -> loosened tolerance vs f32 ref.
    max_err = float(jnp.max(jnp.abs(out - ref)))
    assert jnp.allclose(out, ref, atol=5e-2, rtol=5e-2), (
        "max abs err = %f" % max_err)

    print("KERNEL_OK")
</pallas_src>

<mosaic_0001>
module attributes {stable_mosaic.version = 11 : i64} {
  func.func @_mlp_kernel(%arg0: i32, %arg1: memref<504x16xbf16, #tpu.memory_space<vmem>>, %arg2: memref<16x128xbf16, #tpu.memory_space<vmem>>, %arg3: memref<1x128xf32, #tpu.memory_space<vmem>>, %arg4: memref<128x128xbf16, #tpu.memory_space<vmem>>, %arg5: memref<1x128xf32, #tpu.memory_space<vmem>>, %arg6: memref<128x128xbf16, #tpu.memory_space<vmem>>, %arg7: memref<1x128xf32, #tpu.memory_space<vmem>>, %arg8: memref<128x16xbf16, #tpu.memory_space<vmem>>, %arg9: memref<1x16xf32, #tpu.memory_space<vmem>>, %arg10: memref<504x16xf32, #tpu.memory_space<vmem>>) attributes {dimension_semantics = [#tpu.dimension_semantics<parallel>], iteration_bounds = array<i64: 1>, scalar_prefetch = 0 : i64, scratch_operands = 0 : i64, tpu.core_type = #tpu.core_type<tc>, window_params = [{transform_indices = @transform_0, window_bounds = array<i64: 504, 16>}, {pipeline_mode = #tpu.pipeline_mode<synchronous>, transform_indices = @transform_1, window_bounds = array<i64: 16, 128>}, {pipeline_mode = #tpu.pipeline_mode<synchronous>, transform_indices = @transform_2, window_bounds = array<i64: 1, 128>}, {pipeline_mode = #tpu.pipeline_mode<synchronous>, transform_indices = @transform_3, window_bounds = array<i64: 128, 128>}, {pipeline_mode = #tpu.pipeline_mode<synchronous>, transform_indices = @transform_4, window_bounds = array<i64: 1, 128>}, {pipeline_mode = #tpu.pipeline_mode<synchronous>, transform_indices = @transform_5, window_bounds = array<i64: 128, 128>}, {pipeline_mode = #tpu.pipeline_mode<synchronous>, transform_indices = @transform_6, window_bounds = array<i64: 1, 128>}, {pipeline_mode = #tpu.pipeline_mode<synchronous>, transform_indices = @transform_7, window_bounds = array<i64: 128, 16>}, {pipeline_mode = #tpu.pipeline_mode<synchronous>, transform_indices = @transform_8, window_bounds = array<i64: 1, 16>}, {transform_indices = @transform_9, window_bounds = array<i64: 504, 16>}]} {
    %c0 = arith.constant 0 : index
    %c0_0 = arith.constant 0 : index
    %0 = vector.load %arg1[%c0, %c0_0] : memref<504x16xbf16, #tpu.memory_space<vmem>>, vector<504x16xbf16>
    %c0_1 = arith.constant 0 : index
    %c0_2 = arith.constant 0 : index
    %1 = vector.load %arg2[%c0_1, %c0_2] : memref<16x128xbf16, #tpu.memory_space<vmem>>, vector<16x128xbf16>
    %cst = arith.constant dense<0.000000e+00> : vector<504x128xf32>
    %2 = tpu.matmul %0, %1, %cst {dimension_numbers = #tpu.dot_dimension_numbers<[1], [0], [0], [1], [0, 0, 1, 1], [], []>} : vector<504x16xbf16>, vector<16x128xbf16>, vector<504x128xf32> -> vector<504x128xf32>
    %c0_3 = arith.constant 0 : index
    %c0_4 = arith.constant 0 : index
    %3 = vector.load %arg3[%c0_3, %c0_4] : memref<1x128xf32, #tpu.memory_space<vmem>>, vector<1x128xf32>
    %4 = vector.broadcast %3 : vector<1x128xf32> to vector<504x128xf32>
    %5 = arith.addf %2, %4 : vector<504x128xf32>
    %cst_5 = arith.constant 0.000000e+00 : f32
    %6 = vector.broadcast %cst_5 : f32 to vector<504x128xf32>
    %7 = arith.maximumf %5, %6 : vector<504x128xf32>
    %8 = arith.truncf %7 : vector<504x128xf32> to vector<504x128xbf16>
    %c0_6 = arith.constant 0 : index
    %c0_7 = arith.constant 0 : index
    %9 = vector.load %arg4[%c0_6, %c0_7] : memref<128x128xbf16, #tpu.memory_space<vmem>>, vector<128x128xbf16>
    %cst_8 = arith.constant dense<0.000000e+00> : vector<504x128xf32>
    %10 = tpu.matmul %8, %9, %cst_8 {dimension_numbers = #tpu.dot_dimension_numbers<[1], [0], [0], [1], [0, 0, 1, 1], [], []>} : vector<504x128xbf16>, vector<128x128xbf16>, vector<504x128xf32> -> vector<504x128xf32>
    %c0_9 = arith.constant 0 : index
    %c0_10 = arith.constant 0 : index
    %11 = vector.load %arg5[%c0_9, %c0_10] : memref<1x128xf32, #tpu.memory_space<vmem>>, vector<1x128xf32>
    %12 = vector.broadcast %11 : vector<1x128xf32> to vector<504x128xf32>
    %13 = arith.addf %10, %12 : vector<504x128xf32>
    %cst_11 = arith.constant 0.000000e+00 : f32
    %14 = vector.broadcast %cst_11 : f32 to vector<504x128xf32>
    %15 = arith.maximumf %13, %14 : vector<504x128xf32>
    %16 = arith.truncf %15 : vector<504x128xf32> to vector<504x128xbf16>
    %c0_12 = arith.constant 0 : index
    %c0_13 = arith.constant 0 : index
    %17 = vector.load %arg6[%c0_12, %c0_13] : memref<128x128xbf16, #tpu.memory_space<vmem>>, vector<128x128xbf16>
    %cst_14 = arith.constant dense<0.000000e+00> : vector<504x128xf32>
    %18 = tpu.matmul %16, %17, %cst_14 {dimension_numbers = #tpu.dot_dimension_numbers<[1], [0], [0], [1], [0, 0, 1, 1], [], []>} : vector<504x128xbf16>, vector<128x128xbf16>, vector<504x128xf32> -> vector<504x128xf32>
    %c0_15 = arith.constant 0 : index
    %c0_16 = arith.constant 0 : index
    %19 = vector.load %arg7[%c0_15, %c0_16] : memref<1x128xf32, #tpu.memory_space<vmem>>, vector<1x128xf32>
    %20 = vector.broadcast %19 : vector<1x128xf32> to vector<504x128xf32>
    %21 = arith.addf %18, %20 : vector<504x128xf32>
    %cst_17 = arith.constant 0.000000e+00 : f32
    %22 = vector.broadcast %cst_17 : f32 to vector<504x128xf32>
    %23 = arith.maximumf %21, %22 : vector<504x128xf32>
    %24 = arith.truncf %23 : vector<504x128xf32> to vector<504x128xbf16>
    %c0_18 = arith.constant 0 : index
    %c0_19 = arith.constant 0 : index
    %25 = vector.load %arg8[%c0_18, %c0_19] : memref<128x16xbf16, #tpu.memory_space<vmem>>, vector<128x16xbf16>
    %cst_20 = arith.constant dense<0.000000e+00> : vector<504x16xf32>
    %26 = tpu.matmul %24, %25, %cst_20 {dimension_numbers = #tpu.dot_dimension_numbers<[1], [0], [0], [1], [0, 0, 1, 1], [], []>} : vector<504x128xbf16>, vector<128x16xbf16>, vector<504x16xf32> -> vector<504x16xf32>
    %c0_21 = arith.constant 0 : index
    %c0_22 = arith.constant 0 : index
    %27 = vector.load %arg9[%c0_21, %c0_22] : memref<1x16xf32, #tpu.memory_space<vmem>>, vector<1x16xf32>
    %28 = vector.broadcast %27 : vector<1x16xf32> to vector<504x16xf32>
    %29 = arith.addf %26, %28 : vector<504x16xf32>
    %c0_23 = arith.constant 0 : index
    %c0_24 = arith.constant 0 : index
    %30 = vector.load %arg10[%c0_23, %c0_24] : memref<504x16xf32, #tpu.memory_space<vmem>>, vector<504x16xf32>
    tpu.vector_store %arg10[%c0_23, %c0_24], %29 {strides = array<i32>} : memref<504x16xf32, #tpu.memory_space<vmem>>, vector<504x16xf32>,
    return
  }
  func.func @transform_0(%arg0: i32) -> (i32, i32) {
    %c0_i32 = arith.constant 0 : i32
    %c0_i32_0 = arith.constant 0 : i32
    return %arg0, %c0_i32 : i32, i32
  }
  func.func @transform_1(%arg0: i32) -> (i32, i32) {
    %c0_i32 = arith.constant 0 : i32
    %c0_i32_0 = arith.constant 0 : i32
    %c0_i32_1 = arith.constant 0 : i32
    return %c0_i32, %c0_i32_0 : i32, i32
  }
  func.func @transform_2(%arg0: i32) -> (i32, i32) {
    %c0_i32 = arith.constant 0 : i32
    %c0_i32_0 = arith.constant 0 : i32
    %c0_i32_1 = arith.constant 0 : i32
    return %c0_i32, %c0_i32_0 : i32, i32
  }
  func.func @transform_3(%arg0: i32) -> (i32, i32) {
    %c0_i32 = arith.constant 0 : i32
    %c0_i32_0 = arith.constant 0 : i32
    %c0_i32_1 = arith.constant 0 : i32
    return %c0_i32, %c0_i32_0 : i32, i32
  }
  func.func @transform_4(%arg0: i32) -> (i32, i32) {
    %c0_i32 = arith.constant 0 : i32
    %c0_i32_0 = arith.constant 0 : i32
    %c0_i32_1 = arith.constant 0 : i32
    return %c0_i32, %c0_i32_0 : i32, i32
  }
  func.func @transform_5(%arg0: i32) -> (i32, i32) {
    %c0_i32 = arith.constant 0 : i32
    %c0_i32_0 = arith.constant 0 : i32
    %c0_i32_1 = arith.constant 0 : i32
    return %c0_i32, %c0_i32_0 : i32, i32
  }
  func.func @transform_6(%arg0: i32) -> (i32, i32) {
    %c0_i32 = arith.constant 0 : i32
    %c0_i32_0 = arith.constant 0 : i32
    %c0_i32_1 = arith.constant 0 : i32
    return %c0_i32, %c0_i32_0 : i32, i32
  }
  func.func @transform_7(%arg0: i32) -> (i32, i32) {
    %c0_i32 = arith.constant 0 : i32
    %c0_i32_0 = arith.constant 0 : i32
    %c0_i32_1 = arith.constant 0 : i32
    return %c0_i32, %c0_i32_0 : i32, i32
  }
  func.func @transform_8(%arg0: i32) -> (i32, i32) {
    %c0_i32 = arith.constant 0 : i32
    %c0_i32_0 = arith.constant 0 : i32
    %c0_i32_1 = arith.constant 0 : i32
    return %c0_i32, %c0_i32_0 : i32, i32
  }
  func.func @transform_9(%arg0: i32) -> (i32, i32) {
    %c0_i32 = arith.constant 0 : i32
    %c0_i32_0 = arith.constant 0 : i32
    return %arg0, %c0_i32 : i32, i32
  }
}

</mosaic_0001>

<bundles_post_ra>
// kernel: _forward.1
= control target key start
LH: loop header
LB: loop body
LE: loop exit
PB: predicated region body
PF: predicated region fallthrough
CT: control target
= control target key end

     0   :  { %vm269_vm0 = vcmask 130048   ;;  %s3485_s1 = inlined_call_operand.vmem [shape: bf16[16,128], index: 1, kind: input, shape index: {}]   ;;  %s3486_s0 = inlined_call_operand.vmem [shape: bf16[504,16], index: 0, kind: input, shape index: {}]   ;;  %s3487_s3 = inlined_call_operand.vmem [shape: bf16[128,128], index: 3, kind: input, shape index: {}]   ;;  %s3488_s5 = inlined_call_operand.vmem [shape: bf16[128,128], index: 5, kind: input, shape index: {}]   ;;  %s3489_s2 = inlined_call_operand.vmem [shape: f32[1,128], index: 2, kind: input, shape index: {}]   ;;  %s3490_s7 = inlined_call_operand.vmem [shape: bf16[128,16], index: 7, kind: input, shape index: {}]   ;;  %s3491_s4 = inlined_call_operand.vmem [shape: f32[1,128], index: 4, kind: input, shape index: {}]   ;;  %s3492_s6 = inlined_call_operand.vmem [shape: f32[1,128], index: 6, kind: input, shape index: {}]   ;;  %s3493_s8 = inlined_call_operand.vmem [shape: f32[1,16], index: 8, kind: input, shape index: {}]   ;;  %s3494_s9 = inlined_call_operand.vmem [shape: f32[504,16], index: 9, kind: output, shape index: {}]  }
   0x1   :  { %v2651_v0 = vld [vmem:[%s3485_s1] sm:$0xff]   ;;  %v2653_v2 = vld [vmem:[%s3486_s0 + $0x8] sm:$0xff]   ;;  %v2654_v3 = vld [vmem:[%s3486_s0 + $0x10] sm:$0xff]  }
   0x2   :  { %v2652_v1 = vld [vmem:[%s3486_s0] sm:$0xff]   ;;  %2329 = vmatprep.subr.bf16.mxu0 %v2651_v0  ;;  %v2655_v4 = vld [vmem:[%s3486_s0 + $0x18] sm:$0xff]   ;;  %v2657_v6 = vld [vmem:[%s3486_s0 + $0x28] sm:$0xff]  }
   0x3   :  { %2330 = vmatpush3.bf16.msra.mxu0 %v2651_v0  ;;  %2331 = vmatprep.mubr.msk.bf16.mxu0 %vm269_vm0, %v2652_v1  ;;  %v2656_v5 = vld [vmem:[%s3486_s0 + $0x20] sm:$0xff]   ;;  %v2658_v7 = vld [vmem:[%s3486_s0 + $0x30] sm:$0xff]   ;;  %v2659_v8 = vld [vmem:[%s3486_s0 + $0x38] sm:$0xff]  }
   0x4   :  { %v2660_v9 = vld [vmem:[%s3486_s0 + $0x40] sm:$0xff]   ;;  %v2661_v10 = vld [vmem:[%s3486_s0 + $0x48] sm:$0xff]   ;;  %v2684_v11 = vld [vmem:[%s3487_s3 + $0x38] sm:$0xff]  }
   0x5   :  { %v2685_v12 = vld [vmem:[%s3487_s3 + $0x30] sm:$0xff]   ;;  %2395 = vmatprep.subr.bf16.mxu1 %v2684_v11  ;;  %v2686_v14 = vld [vmem:[%s3487_s3 + $0x28] sm:$0xff]   ;;  %v2687_v15 = vld [vmem:[%s3487_s3 + $0x20] sm:$0xff]  }
   0x6   :  { %2332 = vmatmul.mubr.msk.bf16.vlgmr.msra.gmra.mxu0 %vm269_vm0, %v2653_v2  ;;  %v2662_v13 = vld [vmem:[%s3486_s0 + $0x50] sm:$0xff]   ;;  %2396 = vmatpush3.bf16.msra.mxu1 %v2684_v11  ;;  %v2663_v16 = vld [vmem:[%s3486_s0 + $0x58] sm:$0xff]   ;;  %v2664_v17 = vld [vmem:[%s3486_s0 + $0x60] sm:$0xff]  }
   0x7   :  { %2335 = vmatprep.mubr.msk.bf16.mxu0 %vm269_vm0, %v2654_v3  ;;  %2397 = vmatprep.subr.bf16.mxu1 %v2685_v12  ;;  %v2688_v18 = vld [vmem:[%s3487_s3 + $0x18] sm:$0xff]   ;;  %v2665_v19 = vld [vmem:[%s3486_s0 + $0x68] sm:$0xff]   ;;  %v2666_v20 = vld [vmem:[%s3486_s0 + $0x70] sm:$0xff]  }
   0x8   :  { %v2667_v21 = vld [vmem:[%s3486_s0 + $0x78] sm:$0xff]   ;;  %v2668_v22 = vld [vmem:[%s3486_s0 + $0x80] sm:$0xff]   ;;  %v2669_v23 = vld [vmem:[%s3486_s0 + $0x88] sm:$0xff]  }
   0x9   :  { %v2670_v24 = vld [vmem:[%s3486_s0 + $0x90] sm:$0xff]   ;;  %v2671_v26 = vld [vmem:[%s3486_s0 + $0x98] sm:$0xff]   ;;  %v2690_v27 = vld [vmem:[%s3487_s3 + $0x8] sm:$0xff]  }
   0xa   :  { %2398 = vmatpush3.bf16.msra.mxu1 %v2685_v12  ;;  %v2689_v25 = vld [vmem:[%s3487_s3 + $0x10] sm:$0xff]   ;;  %v2672_v28 = vld [vmem:[%s3486_s0 + $0xa0] sm:$0xff]   ;;  %v2673_v30 = vld [vmem:[%s3486_s0 + $0xa8] sm:$0xff]  }
   0xb   :  { %2399 = vmatprep.subr.bf16.mxu1 %v2686_v14  ;;  %v2691_v29 = vld [vmem:[%s3487_s3] sm:$0xff]   ;;  %v2674_v31 = vld [vmem:[%s3486_s0 + $0xb0] sm:$0xff]   ;;  %v2675_v32 = vld [vmem:[%s3486_s0 + $0xb8] sm:$0xff]  }
   0xc   :  { %v2676_v33 = vld [vmem:[%s3486_s0 + $0xc0] sm:$0xff]   ;;  %v2677_v34 = vld [vmem:[%s3486_s0 + $0xc8] sm:$0xff]   ;;  %v2678_v35 = vld [vmem:[%s3486_s0 + $0xd0] sm:$0xff]  }
   0xd   :  { %v2679_v36 = vld [vmem:[%s3486_s0 + $0xd8] sm:$0xff]   ;;  %v2680_v37 = vld [vmem:[%s3486_s0 + $0xe0] sm:$0xff]   ;;  %v2681_v38 = vld [vmem:[%s3486_s0 + $0xe8] sm:$0xff]  }
   0xe   :  { %2336 = vmatmul.mubr.msk.bf16.gmra.mxu0 %vm269_vm0, %v2655_v4  ;;  %2400 = vmatpush3.bf16.msra.mxu1 %v2686_v14  ;;  %v2682_v39 = vld [vmem:[%s3486_s0 + $0xf0] sm:$0xff]   ;;  %v2683_v40 = vld [vmem:[%s3486_s0 + $0xf8] ss:$0 sps:$4 sm:$0xff]   ;;  %v2694_v43 = vld [vmem:[%s3488_s5 + $0x28] sm:$0xff]  }
   0xf   :  { %2339 = vmatprep.mubr.msk.bf16.mxu0 %vm269_vm0, %v2656_v5  ;;  %2401 = vmatprep.subr.bf16.mxu1 %v2687_v15  ;;  %v2692_v41 = vld [vmem:[%s3488_s5 + $0x38] sm:$0xff]   ;;  %v2693_v42 = vld [vmem:[%s3488_s5 + $0x30] sm:$0xff]   ;;  %v2925_v46 = vld [vmem:[%s3489_s2] ss:$0 sm:$0xff] }
  0x10   :  { %2475 = vmatprep.subr.bf16.mxu0 %v2692_v41  ;;  %v2695_v52 = vld [vmem:[%s3488_s5 + $0x20] sm:$0xff]   ;;  %v2696_v53 = vld [vmem:[%s3488_s5 + $0x18] sm:$0xff]   ;;  %v2697_v61 = vld [vmem:[%s3488_s5 + $0x10] sm:$0xff]  }
  0x11   :  { %2476 = vmatpush3.bf16.msra.mxu0 %v2692_v41  ;;  %v2698_v5 = vld [vmem:[%s3488_s5 + $0x8] sm:$0xff]  }
  0x12   :  { %2402 = vmatpush3.bf16.msra.mxu1 %v2687_v15  ;;  %2477 = vmatprep.subr.bf16.mxu0 %v2693_v42 }
  0x13   :  { %2403 = vmatprep.subr.bf16.mxu1 %v2688_v18 }
  0x15   :  { %2478 = vmatpush3.bf16.msra.mxu0 %v2693_v42 }
  0x16   :  { %2340 = vmatmul.mubr.msk.bf16.gmra.mxu0 %vm269_vm0, %v2657_v6  ;;  %2404 = vmatpush3.bf16.msra.mxu1 %v2688_v18 }
  0x17   :  { %2343 = vmatprep.mubr.msk.bf16.mxu0 %vm269_vm0, %v2658_v7  ;;  %2405 = vmatprep.subr.bf16.mxu1 %v2689_v25 }
  0x18   :  { %2479 = vmatprep.subr.bf16.mxu0 %v2694_v43 }
  0x19   :  { %2480 = vmatpush3.bf16.msra.mxu0 %v2694_v43 }
  0x1a   :  { %2406 = vmatpush3.bf16.msra.mxu1 %v2689_v25  ;;  %2481 = vmatprep.subr.bf16.mxu0 %v2695_v52 }
  0x1b   :  { %2407 = vmatprep.subr.bf16.mxu1 %v2690_v27 }
  0x1d   :  { %2482 = vmatpush3.bf16.msra.mxu0 %v2695_v52 }
  0x1e   :  { %2344 = vmatmul.mubr.msk.bf16.gmra.mxu0 %vm269_vm0, %v2659_v8  ;;  %2408 = vmatpush3.bf16.msra.mxu1 %v2690_v27 }
  0x1f   :  { %2347 = vmatprep.mubr.msk.bf16.mxu0 %vm269_vm0, %v2660_v9  ;;  %2409 = vmatprep.subr.bf16.mxu1 %v2691_v29 }
  0x20   :  { %2483 = vmatprep.subr.bf16.mxu0 %v2696_v53 }
  0x21   :  { %2484 = vmatpush3.bf16.msra.mxu0 %v2696_v53 }
  0x22   :  { %2410 = vmatpush3.bf16.msra.mxu1 %v2691_v29  ;;  %2485 = vmatprep.subr.bf16.mxu0 %v2697_v61 }
  0x25   :  { %2486 = vmatpush3.bf16.msra.mxu0 %v2697_v61 }
  0x26   :  { %2348 = vmatmul.mubr.msk.bf16.gmra.mxu0 %vm269_vm0, %v2661_v10  ;;  %2487 = vmatprep.subr.bf16.mxu0 %v2698_v5 }
  0x27   :  { %2351 = vmatprep.mubr.msk.bf16.mxu0 %vm269_vm0, %v2662_v13  ;;  %v2699_v13 = vld [vmem:[%s3488_s5] sm:$0xff]  }
  0x29   :  { %2488 = vmatpush3.bf16.msra.mxu0 %v2698_v5 }
  0x2a   :  { %2489 = vmatprep.subr.bf16.mxu0 %v2699_v13 }
  0x2d   :  { %2490 = vmatpush3.bf16.msra.mxu0 %v2699_v13 }
  0x2e   :  { %2352 = vmatmul.mubr.msk.bf16.gmra.mxu0 %vm269_vm0, %v2663_v16 }
  0x2f   :  { %2355 = vmatprep.mubr.msk.bf16.mxu0 %vm269_vm0, %v2664_v17 }
  0x36   :  { %2356 = vmatmul.mubr.msk.bf16.gmra.mxu0 %vm269_vm0, %v2665_v19 }
  0x37   :  { %2359 = vmatprep.mubr.msk.bf16.mxu0 %vm269_vm0, %v2666_v20 }
  0x3e   :  { %2360 = vmatmul.mubr.msk.bf16.gmra.mxu0 %vm269_vm0, %v2667_v21 }
  0x3f   :  { %2363 = vmatprep.mubr.msk.bf16.mxu0 %vm269_vm0, %v2668_v22 }
  0x46   :  { %2364 = vmatmul.mubr.msk.bf16.gmra.mxu0 %vm269_vm0, %v2669_v23 }
  0x47   :  { %2367 = vmatprep.mubr.msk.bf16.mxu0 %vm269_vm0, %v2670_v24 }
  0x4e   :  { %2368 = vmatmul.mubr.msk.bf16.gmra.mxu0 %vm269_vm0, %v2671_v26 }
  0x4f   :  { %2371 = vmatprep.mubr.msk.bf16.mxu0 %vm269_vm0, %v2672_v28 }
  0x56   :  { %2372 = vmatmul.mubr.msk.bf16.gmra.mxu0 %vm269_vm0, %v2673_v30 }
  0x57   :  { %2375 = vmatprep.mubr.msk.bf16.mxu0 %vm269_vm0, %v2674_v31 }
  0x5e   :  { %2376 = vmatmul.mubr.msk.bf16.gmra.mxu0 %vm269_vm0, %v2675_v32 }
  0x5f   :  { %2379 = vmatprep.mubr.msk.bf16.mxu0 %vm269_vm0, %v2676_v33 }
  0x66   :  { %2380 = vmatmul.mubr.msk.bf16.gmra.mxu0 %vm269_vm0, %v2677_v34 }
  0x67   :  { %2383 = vmatprep.mubr.msk.bf16.mxu0 %vm269_vm0, %v2678_v35 }
  0x6e   :  { %2384 = vmatmul.mubr.msk.bf16.gmra.mxu0 %vm269_vm0, %v2679_v36 }
  0x6f   :  { %2387 = vmatprep.mubr.msk.bf16.mxu0 %vm269_vm0, %v2680_v37 }
  0x76   :  { %2388 = vmatmul.mubr.msk.bf16.gmra.mxu0 %vm269_vm0, %v2681_v38 }
  0x77   :  { %2391 = vmatprep.mubr.msk.bf16.mxu0 %vm269_vm0, %v2682_v39 }
  0x7e   :  { %2392 = vmatmul.mubr.msk.bf16.gmra.mxu0 %vm269_vm0, %v2683_v40 }
  0xc6   :  { %v2333_v44 = vpop.f32.mrf.mxu0 }
  0xc7   :  { %v409_v50 = vadd.f32 %v2333_v44, %v2925_v46 }
  0xc8   :  { %v400_v45 = vpop.f32.mrf.mxu0 }
  0xc9   :  { %v401_v48 = vadd.f32 %v2925_v46, %v400_v45  ;;  %v656_v59 = vmax.f32 %v409_v50, 0.0 }
  0xca   :  { %v2334_v47 = vpop.f32.mrf.mxu0 }
  0xcb   :  { %v412_v49 = vadd.f32 %v2334_v47, %v2925_v46  ;;  %v654_v57 = vmax.f32 %v401_v48, 0.0 }
  0xcc   :  { %v403_v51 = vpop.f32.mrf.mxu0 }
  0xcd   :  { %v404_v54 = vadd.f32 %v2925_v46, %v403_v51  ;;  %v657_v55 = vmax.f32 %v412_v49, 0.0 }
  0xce   :  { %v2337_v56 = vpop.f32.mrf.mxu0 }
  0xcf   :  { %v655_v58 = vmax.f32 %v404_v54, 0.0  ;;  %v718_v63 = vpack.c.bf16 %v657_v55, %v656_v59  ;;  %v425_v3 = vadd.f32 %v2337_v56, %v2925_v46 }
  0xd0   :  { %v416_v60 = vpop.f32.mrf.mxu0 }
  0xd1   :  { %v717_v62 = vpack.c.bf16 %v655_v58, %v654_v57  ;;  %v417_v1 = vadd.f32 %v2925_v46, %v416_v60  ;;  %v660_v11 = vmax.f32 %v425_v3, 0.0 }
  0xd2   :  { %v2338_v0 = vpop.f32.mrf.mxu0 }
  0xd3   :  { %v428_v2 = vadd.f32 %v2338_v0, %v2925_v46  ;;  %2411 = vmatprep.mubr.bf16.mxu1 %v717_v62  ;;  %v658_v9 = vmax.f32 %v417_v1, 0.0 }
  0xd4   :  { %v419_v4 = vpop.f32.mrf.mxu0  ;;  %2412 = vmatmul.mubr.bf16.vlgmr.msra.gmra.mxu1 %v718_v63 }
  0xd5   :  { %v420_v6 = vadd.f32 %v2925_v46, %v419_v4  ;;  %v661_v7 = vmax.f32 %v428_v2, 0.0 }
  0xd6   :  { %v2341_v8 = vpop.f32.mrf.mxu0 }
  0xd7   :  { %v659_v10 = vmax.f32 %v420_v6, 0.0  ;;  %v720_v15 = vpack.c.bf16 %v661_v7, %v660_v11  ;;  %v441_v19 = vadd.f32 %v2341_v8, %v2925_v46 }
  0xd8   :  { %v432_v12 = vpop.f32.mrf.mxu0 }
  0xd9   :  { %v719_v14 = vpack.c.bf16 %v659_v10, %v658_v9  ;;  %v433_v17 = vadd.f32 %v2925_v46, %v432_v12  ;;  %v664_v26 = vmax.f32 %v441_v19, 0.0 }
  0xda   :  { %v2342_v16 = vpop.f32.mrf.mxu0 }
  0xdb   :  { %v444_v18 = vadd.f32 %v2342_v16, %v2925_v46  ;;  %2415 = vmatprep.mubr.bf16.mxu1 %v719_v14  ;;  %v662_v24 = vmax.f32 %v433_v17, 0.0 }
  0xdc   :  { %v435_v20 = vpop.f32.mrf.mxu0  ;;  %2416 = vmatmul.mubr.bf16.gmra.mxu1 %v720_v15 }
  0xdd   :  { %v436_v21 = vadd.f32 %v2925_v46, %v435_v20  ;;  %v665_v22 = vmax.f32 %v444_v18, 0.0 }
  0xde   :  { %v2345_v23 = vpop.f32.mrf.mxu0 }
  0xdf   :  { %v663_v25 = vmax.f32 %v436_v21, 0.0  ;;  %v722_v29 = vpack.c.bf16 %v665_v22, %v664_v26  ;;  %v457_v33 = vadd.f32 %v2345_v23, %v2925_v46 }
  0xe0   :  { %v448_v27 = vpop.f32.mrf.mxu0 }
  0xe1   :  { %v721_v28 = vpack.c.bf16 %v663_v25, %v662_v24  ;;  %v449_v31 = vadd.f32 %v2925_v46, %v448_v27  ;;  %v668_v40 = vmax.f32 %v457_v33, 0.0 }
  0xe2   :  { %v2346_v30 = vpop.f32.mrf.mxu0 }
  0xe3   :  { %v460_v32 = vadd.f32 %v2346_v30, %v2925_v46  ;;  %2419 = vmatprep.mubr.bf16.mxu1 %v721_v28  ;;  %v666_v38 = vmax.f32 %v449_v31, 0.0 }
  0xe4   :  { %v451_v34 = vpop.f32.mrf.mxu0  ;;  %2420 = vmatmul.mubr.bf16.gmra.mxu1 %v722_v29 }
  0xe5   :  { %v452_v35 = vadd.f32 %v2925_v46, %v451_v34  ;;  %v669_v36 = vmax.f32 %v460_v32, 0.0 }
  0xe6   :  { %v2349_v37 = vpop.f32.mrf.mxu0 }
  0xe7   :  { %v667_v39 = vmax.f32 %v452_v35, 0.0  ;;  %v724_v43 = vpack.c.bf16 %v669_v36, %v668_v40  ;;  %v473_v48 = vadd.f32 %v2349_v37, %v2925_v46 }
  0xe8   :  { %v464_v41 = vpop.f32.mrf.mxu0 }
  0xe9   :  { %v723_v42 = vpack.c.bf16 %v667_v39, %v666_v38  ;;  %v465_v45 = vadd.f32 %v2925_v46, %v464_v41  ;;  %v672_v55 = vmax.f32 %v473_v48, 0.0 }
  0xea   :  { %v2350_v44 = vpop.f32.mrf.mxu0 }
  0xeb   :  { %v476_v47 = vadd.f32 %v2350_v44, %v2925_v46  ;;  %2423 = vmatprep.mubr.bf16.mxu1 %v723_v42  ;;  %v670_v53 = vmax.f32 %v465_v45, 0.0 }
  0xec   :  { %v467_v49 = vpop.f32.mrf.mxu0  ;;  %2424 = vmatmul.mubr.bf16.gmra.mxu1 %v724_v43 }
  0xed   :  { %v468_v50 = vadd.f32 %v2925_v46, %v467_v49  ;;  %v673_v51 = vmax.f32 %v476_v47, 0.0 }
  0xee   :  { %v2353_v52 = vpop.f32.mrf.mxu0 }
  0xef   :  { %v671_v54 = vmax.f32 %v468_v50, 0.0  ;;  %v726_v58 = vpack.c.bf16 %v673_v51, %v672_v55  ;;  %v489_v62 = vadd.f32 %v2353_v52, %v2925_v46 }
  0xf0   :  { %v480_v56 = vpop.f32.mrf.mxu0 }
  0xf1   :  { %v725_v57 = vpack.c.bf16 %v671_v54, %v670_v53  ;;  %v481_v60 = vadd.f32 %v2925_v46, %v480_v56  ;;  %v676_v5 = vmax.f32 %v489_v62, 0.0 }
  0xf2   :  { %v2354_v59 = vpop.f32.mrf.mxu0 }
  0xf3   :  { %v492_v61 = vadd.f32 %v2354_v59, %v2925_v46  ;;  %2427 = vmatprep.mubr.bf16.mxu1 %v725_v57  ;;  %v674_v3 = vmax.f32 %v481_v60, 0.0 }
  0xf4   :  { %v483_v63 = vpop.f32.mrf.mxu0  ;;  %2428 = vmatmul.mubr.bf16.gmra.mxu1 %v726_v58 }
  0xf5   :  { %v484_v0 = vadd.f32 %v2925_v46, %v483_v63  ;;  %v677_v1 = vmax.f32 %v492_v61, 0.0 }
  0xf6   :  { %v2357_v2 = vpop.f32.mrf.mxu0 }
  0xf7   :  { %v675_v4 = vmax.f32 %v484_v0, 0.0  ;;  %v728_v8 = vpack.c.bf16 %v677_v1, %v676_v5  ;;  %v505_v12 = vadd.f32 %v2357_v2, %v2925_v46 }
  0xf8   :  { %v496_v6 = vpop.f32.mrf.mxu0 }
  0xf9   :  { %v727_v7 = vpack.c.bf16 %v675_v4, %v674_v3  ;;  %v497_v10 = vadd.f32 %v2925_v46, %v496_v6  ;;  %v680_v19 = vmax.f32 %v505_v12, 0.0 }
  0xfa   :  { %v2358_v9 = vpop.f32.mrf.mxu0 }
  0xfb   :  { %v508_v11 = vadd.f32 %v2358_v9, %v2925_v46  ;;  %2431 = vmatprep.mubr.bf16.mxu1 %v727_v7  ;;  %v678_v17 = vmax.f32 %v497_v10, 0.0 }
  0xfc   :  { %v499_v13 = vpop.f32.mrf.mxu0  ;;  %2432 = vmatmul.mubr.bf16.gmra.mxu1 %v728_v8 }
  0xfd   :  { %v500_v14 = vadd.f32 %v2925_v46, %v499_v13  ;;  %v681_v15 = vmax.f32 %v508_v11, 0.0 }
  0xfe   :  { %v2361_v16 = vpop.f32.mrf.mxu0 }
  0xff   :  { %v679_v18 = vmax.f32 %v500_v14, 0.0  ;;  %v730_v22 = vpack.c.bf16 %v681_v15, %v680_v19  ;;  %v521_v26 = vadd.f32 %v2361_v16, %v2925_v46 }
 0x100   :  { %v512_v20 = vpop.f32.mrf.mxu0 }
 0x101   :  { %v729_v21 = vpack.c.bf16 %v679_v18, %v678_v17  ;;  %v513_v24 = vadd.f32 %v2925_v46, %v512_v20  ;;  %v684_v33 = vmax.f32 %v521_v26, 0.0 }
 0x102   :  { %v2362_v23 = vpop.f32.mrf.mxu0 }
 0x103   :  { %v524_v25 = vadd.f32 %v2362_v23, %v2925_v46  ;;  %2435 = vmatprep.mubr.bf16.mxu1 %v729_v21  ;;  %v682_v31 = vmax.f32 %v513_v24, 0.0 }
 0x104   :  { %v515_v27 = vpop.f32.mrf.mxu0  ;;  %2436 = vmatmul.mubr.bf16.gmra.mxu1 %v730_v22 }
 0x105   :  { %v516_v28 = vadd.f32 %v2925_v46, %v515_v27  ;;  %v685_v29 = vmax.f32 %v524_v25, 0.0 }
 0x106   :  { %v2365_v30 = vpop.f32.mrf.mxu0 }
 0x107   :  { %v683_v32 = vmax.f32 %v516_v28, 0.0  ;;  %v732_v36 = vpack.c.bf16 %v685_v29, %v684_v33  ;;  %v537_v40 = vadd.f32 %v2365_v30, %v2925_v46 }
 0x108   :  { %v528_v34 = vpop.f32.mrf.mxu0 }
 0x109   :  { %v731_v35 = vpack.c.bf16 %v683_v32, %v682_v31  ;;  %v529_v38 = vadd.f32 %v2925_v46, %v528_v34  ;;  %v688_v48 = vmax.f32 %v537_v40, 0.0 }
 0x10a   :  { %v2366_v37 = vpop.f32.mrf.mxu0 }
 0x10b   :  { %v540_v39 = vadd.f32 %v2366_v37, %v2925_v46  ;;  %2439 = vmatprep.mubr.bf16.mxu1 %v731_v35  ;;  %v686_v45 = vmax.f32 %v529_v38, 0.0 }
 0x10c   :  { %v531_v41 = vpop.f32.mrf.mxu0  ;;  %2440 = vmatmul.mubr.bf16.gmra.mxu1 %v732_v36 }
 0x10d   :  { %v532_v42 = vadd.f32 %v2925_v46, %v531_v41  ;;  %v689_v43 = vmax.f32 %v540_v39, 0.0 }
 0x10e   :  { %v2369_v44 = vpop.f32.mrf.mxu0 }
 0x10f   :  { %v687_v47 = vmax.f32 %v532_v42, 0.0  ;;  %v734_v51 = vpack.c.bf16 %v689_v43, %v688_v48  ;;  %v553_v55 = vadd.f32 %v2369_v44, %v2925_v46 }
 0x110   :  { %v544_v49 = vpop.f32.mrf.mxu0 }
 0x111   :  { %v733_v50 = vpack.c.bf16 %v687_v47, %v686_v45  ;;  %v545_v53 = vadd.f32 %v2925_v46, %v544_v49  ;;  %v692_v62 = vmax.f32 %v553_v55, 0.0 }
 0x112   :  { %v2370_v52 = vpop.f32.mrf.mxu0 }
 0x113   :  { %v556_v54 = vadd.f32 %v2370_v52, %v2925_v46  ;;  %2443 = vmatprep.mubr.bf16.mxu1 %v733_v50  ;;  %v690_v60 = vmax.f32 %v545_v53, 0.0 }
 0x114   :  { %v547_v56 = vpop.f32.mrf.mxu0  ;;  %2444 = vmatmul.mubr.bf16.gmra.mxu1 %v734_v51 }
 0x115   :  { %v548_v57 = vadd.f32 %v2925_v46, %v547_v56  ;;  %v693_v58 = vmax.f32 %v556_v54, 0.0 }
 0x116   :  { %v2373_v59 = vpop.f32.mrf.mxu0 }
 0x117   :  { %v691_v61 = vmax.f32 %v548_v57, 0.0  ;;  %v736_v1 = vpack.c.bf16 %v693_v58, %v692_v62  ;;  %v569_v5 = vadd.f32 %v2373_v59, %v2925_v46 }
 0x118   :  { %v560_v63 = vpop.f32.mrf.mxu0 }
 0x119   :  { %v735_v0 = vpack.c.bf16 %v691_v61, %v690_v60  ;;  %v561_v3 = vadd.f32 %v2925_v46, %v560_v63  ;;  %v696_v12 = vmax.f32 %v569_v5, 0.0 }
 0x11a   :  { %v2374_v2 = vpop.f32.mrf.mxu0 }
 0x11b   :  { %v572_v4 = vadd.f32 %v2374_v2, %v2925_v46  ;;  %2447 = vmatprep.mubr.bf16.mxu1 %v735_v0  ;;  %v694_v10 = vmax.f32 %v561_v3, 0.0 }
 0x11c   :  { %v563_v6 = vpop.f32.mrf.mxu0  ;;  %2448 = vmatmul.mubr.bf16.gmra.mxu1 %v736_v1 }
 0x11d   :  { %v564_v7 = vadd.f32 %v2925_v46, %v563_v6  ;;  %v697_v8 = vmax.f32 %v572_v4, 0.0 }
 0x11e   :  { %v2377_v9 = vpop.f32.mrf.mxu0 }
 0x11f   :  { %v695_v11 = vmax.f32 %v564_v7, 0.0  ;;  %v738_v15 = vpack.c.bf16 %v697_v8, %v696_v12  ;;  %v585_v19 = vadd.f32 %v2377_v9, %v2925_v46 }
 0x120   :  { %v576_v13 = vpop.f32.mrf.mxu0 }
 0x121   :  { %v737_v14 = vpack.c.bf16 %v695_v11, %v694_v10  ;;  %v577_v17 = vadd.f32 %v2925_v46, %v576_v13  ;;  %v700_v26 = vmax.f32 %v585_v19, 0.0  ;;  %v2700_v19 = vld [vmem:[%s3490_s7 + $0x38] sm:$0xff]  }
 0x122   :  { %v2378_v16 = vpop.f32.mrf.mxu0  ;;  %2635 = vmatprep.subr.bf16.mxu1 %v2700_v19  ;;  %2555 = vmatprep.subr.bf16.mxu0 %v2700_v19 }
 0x123   :  { %v588_v18 = vadd.f32 %v2378_v16, %v2925_v46  ;;  %2451 = vmatprep.mubr.bf16.mxu1 %v737_v14  ;;  %v698_v24 = vmax.f32 %v577_v17, 0.0  ;;  %2643 = vmatpush3.bf16.msra.mxu1 %v2700_v19 }
 0x124   :  { %v579_v20 = vpop.f32.mrf.mxu0  ;;  %2452 = vmatmul.mubr.bf16.gmra.mxu1 %v738_v15 }
 0x125   :  { %v580_v21 = vadd.f32 %v2925_v46, %v579_v20  ;;  %v701_v22 = vmax.f32 %v588_v18, 0.0  ;;  %v2701_v20 = vld [vmem:[%s3490_s7 + $0x30] sm:$0xff]  }
 0x126   :  { %v2381_v23 = vpop.f32.mrf.mxu0  ;;  %2636 = vmatprep.subr.bf16.mxu1 %v2701_v20 }
 0x127   :  { %v699_v25 = vmax.f32 %v580_v21, 0.0  ;;  %v740_v29 = vpack.c.bf16 %v701_v22, %v700_v26  ;;  %v601_v33 = vadd.f32 %v2381_v23, %v2925_v46  ;;  %2644 = vmatpush3.bf16.msra.mxu1 %v2701_v20  ;;  %v3014_v22 = vld [vmem:[%s3491_s4] ss:$0 sm:$0xff]  ;;  %v2702_v23 = vld [vmem:[%s3490_s7 + $0x28] sm:$0xff]  }
 0x128   :  { %v592_v27 = vpop.f32.mrf.mxu0  ;;  %2637 = vmatprep.subr.bf16.mxu1 %v2702_v23 }
 0x129   :  { %v739_v28 = vpack.c.bf16 %v699_v25, %v698_v24  ;;  %v593_v31 = vadd.f32 %v2925_v46, %v592_v27  ;;  %v704_v40 = vmax.f32 %v601_v33, 0.0 }
 0x12a   :  { %v2382_v30 = vpop.f32.mrf.mxu0 }
 0x12b   :  { %v604_v32 = vadd.f32 %v2382_v30, %v2925_v46  ;;  %2455 = vmatprep.mubr.bf16.mxu1 %v739_v28  ;;  %v702_v38 = vmax.f32 %v593_v31, 0.0  ;;  %2645 = vmatpush3.bf16.msra.mxu1 %v2702_v23 }
 0x12c   :  { %v595_v34 = vpop.f32.mrf.mxu0  ;;  %2456 = vmatmul.mubr.bf16.gmra.mxu1 %v740_v29  ;;  %v2703_v29 = vld [vmem:[%s3490_s7 + $0x20] sm:$0xff]  }
 0x12d   :  { %v596_v35 = vadd.f32 %v2925_v46, %v595_v34  ;;  %v705_v36 = vmax.f32 %v604_v32, 0.0  ;;  %2638 = vmatprep.subr.bf16.mxu1 %v2703_v29 }
 0x12e   :  { %v2385_v37 = vpop.f32.mrf.mxu0 }
 0x12f   :  { %v703_v39 = vmax.f32 %v596_v35, 0.0  ;;  %v742_v43 = vpack.c.bf16 %v705_v36, %v704_v40  ;;  %v617_v48 = vadd.f32 %v2385_v37, %v2925_v46  ;;  %v2704_v35 = vld [vmem:[%s3490_s7 + $0x18] sm:$0xff]   ;;  %2646 = vmatpush3.bf16.msra.mxu1 %v2703_v29 }
 0x130   :  { %v608_v41 = vpop.f32.mrf.mxu0  ;;  %2639 = vmatprep.subr.bf16.mxu1 %v2704_v35 }
 0x131   :  { %v741_v42 = vpack.c.bf16 %v703_v39, %v702_v38  ;;  %v609_v45 = vadd.f32 %v2925_v46, %v608_v41  ;;  %v708_v55 = vmax.f32 %v617_v48, 0.0 }
 0x132   :  { %v2386_v44 = vpop.f32.mrf.mxu0 }
 0x133   :  { %v620_v47 = vadd.f32 %v2386_v44, %v2925_v46  ;;  %2459 = vmatprep.mubr.bf16.mxu1 %v741_v42  ;;  %v706_v53 = vmax.f32 %v609_v45, 0.0  ;;  %2647 = vmatpush3.bf16.msra.mxu1 %v2704_v35 }
 0x134   :  { %v611_v49 = vpop.f32.mrf.mxu0  ;;  %2460 = vmatmul.mubr.bf16.gmra.mxu1 %v742_v43  ;;  %v2705_v43 = vld [vmem:[%s3490_s7 + $0x10] sm:$0xff]  }
 0x135   :  { %v612_v50 = vadd.f32 %v2925_v46, %v611_v49  ;;  %v709_v51 = vmax.f32 %v620_v47, 0.0  ;;  %2640 = vmatprep.subr.bf16.mxu1 %v2705_v43 }
 0x136   :  { %v2389_v52 = vpop.f32.mrf.mxu0 }
 0x137   :  { %v707_v54 = vmax.f32 %v612_v50, 0.0  ;;  %v744_v58 = vpack.c.bf16 %v709_v51, %v708_v55  ;;  %v633_v62 = vadd.f32 %v2389_v52, %v2925_v46  ;;  %v2706_v52 = vld [vmem:[%s3490_s7 + $0x8] sm:$0xff]   ;;  %2648 = vmatpush3.bf16.msra.mxu1 %v2705_v43 }
 0x138   :  { %v624_v56 = vpop.f32.mrf.mxu0  ;;  %2641 = vmatprep.subr.bf16.mxu1 %v2706_v52 }
 0x139   :  { %v743_v57 = vpack.c.bf16 %v707_v54, %v706_v53  ;;  %v625_v60 = vadd.f32 %v2925_v46, %v624_v56  ;;  %v712_v5 = vmax.f32 %v633_v62, 0.0 }
 0x13a   :  { %v2390_v59 = vpop.f32.mrf.mxu0 }
 0x13b   :  { %v636_v61 = vadd.f32 %v2390_v59, %v2925_v46  ;;  %2463 = vmatprep.mubr.bf16.mxu1 %v743_v57  ;;  %v710_v3 = vmax.f32 %v625_v60, 0.0  ;;  %2649 = vmatpush3.bf16.msra.mxu1 %v2706_v52 }
 0x13c   :  { %v627_v63 = vpop.f32.mrf.mxu0  ;;  %2464 = vmatmul.mubr.bf16.gmra.mxu1 %v744_v58 }
 0x13d   :  { %v628_v0 = vadd.f32 %v2925_v46, %v627_v63  ;;  %v713_v1 = vmax.f32 %v636_v61, 0.0 }
 0x13e   :  { %v2393_v2 = vpop.f32.mrf.mxu0 }
 0x13f   :  { %v711_v4 = vmax.f32 %v628_v0, 0.0  ;;  %v746_v8 = vpack.c.bf16 %v713_v1, %v712_v5  ;;  %v649_v9 = vadd.f32 %v2393_v2, %v2925_v46 }
 0x140   :  { %v640_v6 = vpop.f32.mrf.mxu0 }
 0x141   :  { %v745_v7 = vpack.c.bf16 %v711_v4, %v710_v3  ;;  %v641_v11 = vadd.f32 %v2925_v46, %v640_v6  ;;  %v716_v14 = vmax.f32 %v649_v9, 0.0 }
 0x142   :  { %v2394_v10 = vpop.f32.mrf.mxu0 }
 0x143   :  { %2467 = vmatprep.mubr.bf16.mxu1 %v745_v7  ;;  %v714_v15 = vmax.f32 %v641_v11, 0.0  ;;  %v748_v18 = vpack.c.bf16 %v716_v14, %v716_v14 }
 0x144   :  { %v643_v12 = vpop.f32.mrf.mxu0  ;;  %2468 = vmatmul.mubr.bf16.gmra.mxu1 %v746_v8 }
 0x145   :  { %v644_v13 = vadd.f32 %v2925_v46, %v643_v12 }
 0x147   :  { %v715_v16 = vmax.f32 %v644_v13, 0.0 }
 0x149   :  { %v747_v17 = vpack.c.bf16 %v715_v16, %v714_v15 }
 0x14b   :  { %2471 = vmatprep.mubr.bf16.mxu1 %v747_v17 }
 0x14c   :  { %2472 = vmatmul.mubr.bf16.gmra.mxu1 %v748_v18 }
 0x194   :  { %v2413_v46 = vpop.f32.mrf.mxu1 }
 0x195   :  { %v863_v27 = vadd.f32 %v2413_v46, %v3014_v22 }
 0x196   :  { %v854_v21 = vpop.f32.mrf.mxu1 }
 0x197   :  { %v855_v25 = vadd.f32 %v3014_v22, %v854_v21  ;;  %v1110_v36 = vmax.f32 %v863_v27, 0.0 }
 0x198   :  { %v2414_v24 = vpop.f32.mrf.mxu1 }
 0x199   :  { %v866_v26 = vadd.f32 %v2414_v24, %v3014_v22  ;;  %v1108_v33 = vmax.f32 %v855_v25, 0.0 }
 0x19a   :  { %v857_v28 = vpop.f32.mrf.mxu1 }
 0x19b   :  { %v858_v30 = vadd.f32 %v3014_v22, %v857_v28  ;;  %v1111_v31 = vmax.f32 %v866_v26, 0.0 }
 0x19c   :  { %v2417_v32 = vpop.f32.mrf.mxu1 }
 0x19d   :  { %v1109_v34 = vmax.f32 %v858_v30, 0.0  ;;  %v1172_v39 = vpack.c.bf16 %v1111_v31, %v1110_v36  ;;  %v879_v44 = vadd.f32 %v2417_v32, %v3014_v22 }
 0x19e   :  { %v870_v37 = vpop.f32.mrf.mxu1 }
 0x19f   :  { %v1171_v38 = vpack.c.bf16 %v1109_v34, %v1108_v33  ;;  %v871_v41 = vadd.f32 %v3014_v22, %v870_v37  ;;  %v1114_v53 = vmax.f32 %v879_v44, 0.0 }
 0x1a0   :  { %v2418_v40 = vpop.f32.mrf.mxu1 }
 0x1a1   :  { %v882_v42 = vadd.f32 %v2418_v40, %v3014_v22  ;;  %2491 = vmatprep.mubr.bf16.mxu0 %v1171_v38  ;;  %v1112_v50 = vmax.f32 %v871_v41, 0.0 }
 0x1a2   :  { %v873_v45 = vpop.f32.mrf.mxu1  ;;  %2492 = vmatmul.mubr.bf16.vlgmr.msra.gmra.mxu0 %v1172_v39 }
 0x1a3   :  { %v874_v47 = vadd.f32 %v3014_v22, %v873_v45  ;;  %2556 = vmatpush3.bf16.msra.mxu0 %v2700_v19  ;;  %v1115_v48 = vmax.f32 %v882_v42, 0.0 }
 0x1a4   :  { %v2421_v49 = vpop.f32.mrf.mxu1  ;;  %2557 = vmatprep.subr.bf16.mxu0 %v2701_v20 }
 0x1a5   :  { %v1113_v51 = vmax.f32 %v874_v47, 0.0  ;;  %v1174_v56 = vpack.c.bf16 %v1115_v48, %v1114_v53  ;;  %v895_v60 = vadd.f32 %v2421_v49, %v3014_v22 }
 0x1a6   :  { %v886_v54 = vpop.f32.mrf.mxu1 }
 0x1a7   :  { %v1173_v55 = vpack.c.bf16 %v1113_v51, %v1112_v50  ;;  %2558 = vmatpush3.bf16.msra.mxu0 %v2701_v20  ;;  %v887_v58 = vadd.f32 %v3014_v22, %v886_v54  ;;  %v1118_v3 = vmax.f32 %v895_v60, 0.0 }
 0x1a8   :  { %v2422_v57 = vpop.f32.mrf.mxu1  ;;  %2559 = vmatprep.subr.bf16.mxu0 %v2702_v23 }
 0x1a9   :  { %v898_v59 = vadd.f32 %v2422_v57, %v3014_v22  ;;  %2495 = vmatprep.mubr.bf16.mxu0 %v1173_v55  ;;  %v1116_v1 = vmax.f32 %v887_v58, 0.0 }
 0x1aa   :  { %v889_v61 = vpop.f32.mrf.mxu1  ;;  %2496 = vmatmul.mubr.bf16.gmra.mxu0 %v1174_v56 }
 0x1ab   :  { %v890_v62 = vadd.f32 %v3014_v22, %v889_v61  ;;  %2560 = vmatpush3.bf16.msra.mxu0 %v2702_v23  ;;  %v1119_v63 = vmax.f32 %v898_v59, 0.0 }
 0x1ac   :  { %v2425_v0 = vpop.f32.mrf.mxu1  ;;  %2561 = vmatprep.subr.bf16.mxu0 %v2703_v29 }
 0x1ad   :  { %v1117_v2 = vmax.f32 %v890_v62, 0.0  ;;  %v1176_v6 = vpack.c.bf16 %v1119_v63, %v1118_v3  ;;  %v911_v10 = vadd.f32 %v2425_v0, %v3014_v22 }
 0x1ae   :  { %v902_v4 = vpop.f32.mrf.mxu1 }
 0x1af   :  { %v1175_v5 = vpack.c.bf16 %v1117_v2, %v1116_v1  ;;  %2562 = vmatpush3.bf16.msra.mxu0 %v2703_v29  ;;  %v903_v8 = vadd.f32 %v3014_v22, %v902_v4  ;;  %v1122_v17 = vmax.f32 %v911_v10, 0.0 }
 0x1b0   :  { %v2426_v7 = vpop.f32.mrf.mxu1  ;;  %2563 = vmatprep.subr.bf16.mxu0 %v2704_v35 }
 0x1b1   :  { %v914_v9 = vadd.f32 %v2426_v7, %v3014_v22  ;;  %2499 = vmatprep.mubr.bf16.mxu0 %v1175_v5  ;;  %v1120_v15 = vmax.f32 %v903_v8, 0.0 }
 0x1b2   :  { %v905_v11 = vpop.f32.mrf.mxu1  ;;  %2500 = vmatmul.mubr.bf16.gmra.mxu0 %v1176_v6 }
 0x1b3   :  { %v906_v12 = vadd.f32 %v3014_v22, %v905_v11  ;;  %2564 = vmatpush3.bf16.msra.mxu0 %v2704_v35  ;;  %v1123_v13 = vmax.f32 %v914_v9, 0.0 }
 0x1b4   :  { %v2429_v14 = vpop.f32.mrf.mxu1  ;;  %2565 = vmatprep.subr.bf16.mxu0 %v2705_v43 }
 0x1b5   :  { %v1121_v16 = vmax.f32 %v906_v12, 0.0  ;;  %v1178_v20 = vpack.c.bf16 %v1123_v13, %v1122_v17  ;;  %v927_v24 = vadd.f32 %v2429_v14, %v3014_v22 }
 0x1b6   :  { %v918_v18 = vpop.f32.mrf.mxu1 }
 0x1b7   :  { %v1177_v19 = vpack.c.bf16 %v1121_v16, %v1120_v15  ;;  %2566 = vmatpush3.bf16.msra.mxu0 %v2705_v43  ;;  %v919_v21 = vadd.f32 %v3014_v22, %v918_v18  ;;  %v1126_v31 = vmax.f32 %v927_v24, 0.0 }
 0x1b8   :  { %v2430_v46 = vpop.f32.mrf.mxu1  ;;  %2567 = vmatprep.subr.bf16.mxu0 %v2706_v52 }
 0x1b9   :  { %v930_v23 = vadd.f32 %v2430_v46, %v3014_v22  ;;  %2503 = vmatprep.mubr.bf16.mxu0 %v1177_v19  ;;  %v1124_v29 = vmax.f32 %v919_v21, 0.0 }
 0x1ba   :  { %v921_v25 = vpop.f32.mrf.mxu1  ;;  %2504 = vmatmul.mubr.bf16.gmra.mxu0 %v1178_v20 }
 0x1bb   :  { %v922_v26 = vadd.f32 %v3014_v22, %v921_v25  ;;  %2568 = vmatpush3.bf16.msra.mxu0 %v2706_v52  ;;  %v1127_v27 = vmax.f32 %v930_v23, 0.0 }
 0x1bc   :  { %v2433_v28 = vpop.f32.mrf.mxu1 }
 0x1bd   :  { %v1125_v30 = vmax.f32 %v922_v26, 0.0  ;;  %v1180_v34 = vpack.c.bf16 %v1127_v27, %v1126_v31  ;;  %v943_v38 = vadd.f32 %v2433_v28, %v3014_v22 }
 0x1be   :  { %v934_v32 = vpop.f32.mrf.mxu1 }
 0x1bf   :  { %v1179_v33 = vpack.c.bf16 %v1125_v30, %v1124_v29  ;;  %v935_v36 = vadd.f32 %v3014_v22, %v934_v32  ;;  %v1130_v45 = vmax.f32 %v943_v38, 0.0 }
 0x1c0   :  { %v2434_v35 = vpop.f32.mrf.mxu1 }
 0x1c1   :  { %v946_v37 = vadd.f32 %v2434_v35, %v3014_v22  ;;  %2507 = vmatprep.mubr.bf16.mxu0 %v1179_v33  ;;  %v1128_v43 = vmax.f32 %v935_v36, 0.0 }
 0x1c2   :  { %v937_v39 = vpop.f32.mrf.mxu1  ;;  %2508 = vmatmul.mubr.bf16.gmra.mxu0 %v1180_v34 }
 0x1c3   :  { %v938_v40 = vadd.f32 %v3014_v22, %v937_v39  ;;  %v1131_v41 = vmax.f32 %v946_v37, 0.0 }
 0x1c4   :  { %v2437_v42 = vpop.f32.mrf.mxu1 }
 0x1c5   :  { %v1129_v44 = vmax.f32 %v938_v40, 0.0  ;;  %v1182_v49 = vpack.c.bf16 %v1131_v41, %v1130_v45  ;;  %v959_v53 = vadd.f32 %v2437_v42, %v3014_v22 }
 0x1c6   :  { %v950_v47 = vpop.f32.mrf.mxu1 }
 0x1c7   :  { %v1181_v48 = vpack.c.bf16 %v1129_v44, %v1128_v43  ;;  %v951_v51 = vadd.f32 %v3014_v22, %v950_v47  ;;  %v1134_v60 = vmax.f32 %v959_v53, 0.0 }
 0x1c8   :  { %v2438_v50 = vpop.f32.mrf.mxu1 }
 0x1c9   :  { %v962_v52 = vadd.f32 %v2438_v50, %v3014_v22  ;;  %2511 = vmatprep.mubr.bf16.mxu0 %v1181_v48  ;;  %v1132_v58 = vmax.f32 %v951_v51, 0.0  ;;  %v2707_v48 = vld [vmem:[%s3490_s7] sm:$0xff]  }
 0x1ca   :  { %v953_v54 = vpop.f32.mrf.mxu1  ;;  %2512 = vmatmul.mubr.bf16.gmra.mxu0 %v1182_v49  ;;  %2642 = vmatprep.subr.bf16.mxu1 %v2707_v48 }
 0x1cb   :  { %v954_v55 = vadd.f32 %v3014_v22, %v953_v54  ;;  %v1135_v56 = vmax.f32 %v962_v52, 0.0  ;;  %2569 = vmatprep.subr.bf16.mxu0 %v2707_v48  ;;  %2650 = vmatpush3.bf16.msra.mxu1 %v2707_v48 }
 0x1cc   :  { %v2441_v57 = vpop.f32.mrf.mxu1  ;;  %2570 = vmatpush3.bf16.msra.mxu0 %v2707_v48 }
 0x1cd   :  { %v1133_v59 = vmax.f32 %v954_v55, 0.0  ;;  %v1184_v63 = vpack.c.bf16 %v1135_v56, %v1134_v60  ;;  %v975_v3 = vadd.f32 %v2441_v57, %v3014_v22 }
 0x1ce   :  { %v966_v61 = vpop.f32.mrf.mxu1 }
 0x1cf   :  { %v1183_v62 = vpack.c.bf16 %v1133_v59, %v1132_v58  ;;  %v967_v1 = vadd.f32 %v3014_v22, %v966_v61  ;;  %v1138_v10 = vmax.f32 %v975_v3, 0.0 }
 0x1d0   :  { %v2442_v0 = vpop.f32.mrf.mxu1 }
 0x1d1   :  { %v978_v2 = vadd.f32 %v2442_v0, %v3014_v22  ;;  %2515 = vmatprep.mubr.bf16.mxu0 %v1183_v62  ;;  %v1136_v8 = vmax.f32 %v967_v1, 0.0 }
 0x1d2   :  { %v969_v4 = vpop.f32.mrf.mxu1  ;;  %2516 = vmatmul.mubr.bf16.gmra.mxu0 %v1184_v63 }
 0x1d3   :  { %v970_v5 = vadd.f32 %v3014_v22, %v969_v4  ;;  %v1139_v6 = vmax.f32 %v978_v2, 0.0 }
 0x1d4   :  { %v2445_v7 = vpop.f32.mrf.mxu1 }
 0x1d5   :  { %v1137_v9 = vmax.f32 %v970_v5, 0.0  ;;  %v1186_v13 = vpack.c.bf16 %v1139_v6, %v1138_v10  ;;  %v991_v17 = vadd.f32 %v2445_v7, %v3014_v22 }
 0x1d6   :  { %v982_v11 = vpop.f32.mrf.mxu1 }
 0x1d7   :  { %v1185_v12 = vpack.c.bf16 %v1137_v9, %v1136_v8  ;;  %v983_v15 = vadd.f32 %v3014_v22, %v982_v11  ;;  %v1142_v24 = vmax.f32 %v991_v17, 0.0 }
 0x1d8   :  { %v2446_v14 = vpop.f32.mrf.mxu1 }
 0x1d9   :  { %v994_v16 = vadd.f32 %v2446_v14, %v3014_v22  ;;  %2519 = vmatprep.mubr.bf16.mxu0 %v1185_v12  ;;  %v1140_v21 = vmax.f32 %v983_v15, 0.0 }
 0x1da   :  { %v985_v18 = vpop.f32.mrf.mxu1  ;;  %2520 = vmatmul.mubr.bf16.gmra.mxu0 %v1186_v13 }
 0x1db   :  { %v986_v19 = vadd.f32 %v3014_v22, %v985_v18  ;;  %v1143_v20 = vmax.f32 %v994_v16, 0.0 }
 0x1dc   :  { %v2449_v46 = vpop.f32.mrf.mxu1 }
 0x1dd   :  { %v1141_v23 = vmax.f32 %v986_v19, 0.0  ;;  %v1188_v27 = vpack.c.bf16 %v1143_v20, %v1142_v24  ;;  %v1007_v31 = vadd.f32 %v2449_v46, %v3014_v22 }
 0x1de   :  { %v998_v25 = vpop.f32.mrf.mxu1 }
 0x1df   :  { %v1187_v26 = vpack.c.bf16 %v1141_v23, %v1140_v21  ;;  %v999_v29 = vadd.f32 %v3014_v22, %v998_v25  ;;  %v1146_v38 = vmax.f32 %v1007_v31, 0.0 }
 0x1e0   :  { %v2450_v28 = vpop.f32.mrf.mxu1 }
 0x1e1   :  { %v1010_v30 = vadd.f32 %v2450_v28, %v3014_v22  ;;  %2523 = vmatprep.mubr.bf16.mxu0 %v1187_v26  ;;  %v1144_v36 = vmax.f32 %v999_v29, 0.0 }
 0x1e2   :  { %v1001_v32 = vpop.f32.mrf.mxu1  ;;  %2524 = vmatmul.mubr.bf16.gmra.mxu0 %v1188_v27 }
 0x1e3   :  { %v1002_v33 = vadd.f32 %v3014_v22, %v1001_v32  ;;  %v1147_v34 = vmax.f32 %v1010_v30, 0.0 }
 0x1e4   :  { %v2453_v35 = vpop.f32.mrf.mxu1 }
 0x1e5   :  { %v1145_v37 = vmax.f32 %v1002_v33, 0.0  ;;  %v1190_v41 = vpack.c.bf16 %v1147_v34, %v1146_v38  ;;  %v1023_v45 = vadd.f32 %v2453_v35, %v3014_v22 }
 0x1e6   :  { %v1014_v39 = vpop.f32.mrf.mxu1 }
 0x1e7   :  { %v1189_v40 = vpack.c.bf16 %v1145_v37, %v1144_v36  ;;  %v1015_v43 = vadd.f32 %v3014_v22, %v1014_v39  ;;  %v1150_v54 = vmax.f32 %v1023_v45, 0.0 }
 0x1e8   :  { %v2454_v42 = vpop.f32.mrf.mxu1 }
 0x1e9   :  { %v1026_v44 = vadd.f32 %v2454_v42, %v3014_v22  ;;  %2527 = vmatprep.mubr.bf16.mxu0 %v1189_v40  ;;  %v1148_v52 = vmax.f32 %v1015_v43, 0.0 }
 0x1ea   :  { %v1017_v47 = vpop.f32.mrf.mxu1  ;;  %2528 = vmatmul.mubr.bf16.gmra.mxu0 %v1190_v41 }
 0x1eb   :  { %v1018_v49 = vadd.f32 %v3014_v22, %v1017_v47  ;;  %v1151_v50 = vmax.f32 %v1026_v44, 0.0 }
 0x1ec   :  { %v2457_v51 = vpop.f32.mrf.mxu1 }
 0x1ed   :  { %v1149_v53 = vmax.f32 %v1018_v49, 0.0  ;;  %v1192_v57 = vpack.c.bf16 %v1151_v50, %v1150_v54  ;;  %v1039_v61 = vadd.f32 %v2457_v51, %v3014_v22 }
 0x1ee   :  { %v1030_v55 = vpop.f32.mrf.mxu1 }
 0x1ef   :  { %v1191_v56 = vpack.c.bf16 %v1149_v53, %v1148_v52  ;;  %v1031_v59 = vadd.f32 %v3014_v22, %v1030_v55  ;;  %v1154_v4 = vmax.f32 %v1039_v61, 0.0 }
 0x1f0   :  { %v2458_v58 = vpop.f32.mrf.mxu1 }
 0x1f1   :  { %v1042_v60 = vadd.f32 %v2458_v58, %v3014_v22  ;;  %2531 = vmatprep.mubr.bf16.mxu0 %v1191_v56  ;;  %v1152_v2 = vmax.f32 %v1031_v59, 0.0 }
 0x1f2   :  { %v1033_v62 = vpop.f32.mrf.mxu1  ;;  %2532 = vmatmul.mubr.bf16.gmra.mxu0 %v1192_v57 }
 0x1f3   :  { %v1034_v63 = vadd.f32 %v3014_v22, %v1033_v62  ;;  %v1155_v0 = vmax.f32 %v1042_v60, 0.0 }
 0x1f4   :  { %v2461_v1 = vpop.f32.mrf.mxu1 }
 0x1f5   :  { %v1153_v3 = vmax.f32 %v1034_v63, 0.0  ;;  %v1194_v7 = vpack.c.bf16 %v1155_v0, %v1154_v4  ;;  %v1055_v11 = vadd.f32 %v2461_v1, %v3014_v22  ;;  %v3100_v63 = vld [vmem:[%s3492_s6] ss:$0 sm:$0xff] }
 0x1f6   :  { %v1046_v5 = vpop.f32.mrf.mxu1 }
 0x1f7   :  { %v1193_v6 = vpack.c.bf16 %v1153_v3, %v1152_v2  ;;  %v1047_v9 = vadd.f32 %v3014_v22, %v1046_v5  ;;  %v1158_v18 = vmax.f32 %v1055_v11, 0.0 }
 0x1f8   :  { %v2462_v8 = vpop.f32.mrf.mxu1 }
 0x1f9   :  { %v1058_v10 = vadd.f32 %v2462_v8, %v3014_v22  ;;  %2535 = vmatprep.mubr.bf16.mxu0 %v1193_v6  ;;  %v1156_v16 = vmax.f32 %v1047_v9, 0.0 }
 0x1fa   :  { %v1049_v12 = vpop.f32.mrf.mxu1  ;;  %2536 = vmatmul.mubr.bf16.gmra.mxu0 %v1194_v7 }
 0x1fb   :  { %v1050_v13 = vadd.f32 %v3014_v22, %v1049_v12  ;;  %v1159_v14 = vmax.f32 %v1058_v10, 0.0 }
 0x1fc   :  { %v2465_v15 = vpop.f32.mrf.mxu1 }
 0x1fd   :  { %v1157_v17 = vmax.f32 %v1050_v13, 0.0  ;;  %v1196_v46 = vpack.c.bf16 %v1159_v14, %v1158_v18  ;;  %v1071_v25 = vadd.f32 %v2465_v15, %v3014_v22 }
 0x1fe   :  { %v1062_v19 = vpop.f32.mrf.mxu1 }
 0x1ff   :  { %v1195_v20 = vpack.c.bf16 %v1157_v17, %v1156_v16  ;;  %v1063_v23 = vadd.f32 %v3014_v22, %v1062_v19  ;;  %v1162_v32 = vmax.f32 %v1071_v25, 0.0 }
 0x200   :  { %v2466_v21 = vpop.f32.mrf.mxu1 }
 0x201   :  { %v1074_v24 = vadd.f32 %v2466_v21, %v3014_v22  ;;  %2539 = vmatprep.mubr.bf16.mxu0 %v1195_v20  ;;  %v1160_v30 = vmax.f32 %v1063_v23, 0.0 }
 0x202   :  { %v1065_v26 = vpop.f32.mrf.mxu1  ;;  %2540 = vmatmul.mubr.bf16.gmra.mxu0 %v1196_v46 }
 0x203   :  { %v1066_v27 = vadd.f32 %v3014_v22, %v1065_v26  ;;  %v1163_v28 = vmax.f32 %v1074_v24, 0.0 }
 0x204   :  { %v2469_v29 = vpop.f32.mrf.mxu1 }
 0x205   :  { %v1161_v31 = vmax.f32 %v1066_v27, 0.0  ;;  %v1198_v35 = vpack.c.bf16 %v1163_v28, %v1162_v32  ;;  %v1087_v39 = vadd.f32 %v2469_v29, %v3014_v22 }
 0x206   :  { %v1078_v33 = vpop.f32.mrf.mxu1 }
 0x207   :  { %v1197_v34 = vpack.c.bf16 %v1161_v31, %v1160_v30  ;;  %v1079_v37 = vadd.f32 %v3014_v22, %v1078_v33  ;;  %v1166_v47 = vmax.f32 %v1087_v39, 0.0 }
 0x208   :  { %v2470_v36 = vpop.f32.mrf.mxu1 }
 0x209   :  { %v1090_v38 = vadd.f32 %v2470_v36, %v3014_v22  ;;  %2543 = vmatprep.mubr.bf16.mxu0 %v1197_v34  ;;  %v1164_v44 = vmax.f32 %v1079_v37, 0.0 }
 0x20a   :  { %v1081_v40 = vpop.f32.mrf.mxu1  ;;  %2544 = vmatmul.mubr.bf16.gmra.mxu0 %v1198_v35 }
 0x20b   :  { %v1082_v41 = vadd.f32 %v3014_v22, %v1081_v40  ;;  %v1167_v42 = vmax.f32 %v1090_v38, 0.0 }
 0x20c   :  { %v2473_v43 = vpop.f32.mrf.mxu1 }
 0x20d   :  { %v1165_v45 = vmax.f32 %v1082_v41, 0.0  ;;  %v1200_v50 = vpack.c.bf16 %v1167_v42, %v1166_v47  ;;  %v1103_v51 = vadd.f32 %v2473_v43, %v3014_v22 }
 0x20e   :  { %v1094_v48 = vpop.f32.mrf.mxu1 }
 0x20f   :  { %v1199_v49 = vpack.c.bf16 %v1165_v45, %v1164_v44  ;;  %v1095_v53 = vadd.f32 %v3014_v22, %v1094_v48  ;;  %v1170_v56 = vmax.f32 %v1103_v51, 0.0 }
 0x210   :  { %v2474_v52 = vpop.f32.mrf.mxu1 }
 0x211   :  { %2547 = vmatprep.mubr.bf16.mxu0 %v1199_v49  ;;  %v1168_v57 = vmax.f32 %v1095_v53, 0.0  ;;  %v1202_v60 = vpack.c.bf16 %v1170_v56, %v1170_v56 }
 0x212   :  { %v1097_v54 = vpop.f32.mrf.mxu1  ;;  %2548 = vmatmul.mubr.bf16.gmra.mxu0 %v1200_v50 }
 0x213   :  { %v1098_v55 = vadd.f32 %v3014_v22, %v1097_v54 }
 0x215   :  { %v1169_v58 = vmax.f32 %v1098_v55, 0.0 }
 0x217   :  { %v1201_v59 = vpack.c.bf16 %v1169_v58, %v1168_v57 }
 0x219   :  { %2551 = vmatprep.mubr.bf16.mxu0 %v1201_v59 }
 0x21a   :  { %2552 = vmatmul.mubr.bf16.gmra.mxu0 %v1202_v60 }
 0x262   :  { %v2493_v61 = vpop.f32.mrf.mxu0 }
 0x263   :  { %v1317_v22 = vadd.f32 %v2493_v61, %v3100_v63 }
 0x264   :  { %v1308_v62 = vpop.f32.mrf.mxu0 }
 0x265   :  { %v1309_v1 = vadd.f32 %v3100_v63, %v1308_v62  ;;  %v1564_v9 = vmax.f32 %v1317_v22, 0.0 }
 0x266   :  { %v2494_v0 = vpop.f32.mrf.mxu0 }
 0x267   :  { %v1320_v2 = vadd.f32 %v2494_v0, %v3100_v63  ;;  %v1562_v7 = vmax.f32 %v1309_v1, 0.0 }
 0x268   :  { %v1311_v3 = vpop.f32.mrf.mxu0 }
 0x269   :  { %v1312_v4 = vadd.f32 %v3100_v63, %v1311_v3  ;;  %v1565_v5 = vmax.f32 %v1320_v2, 0.0 }
 0x26a   :  { %v2497_v6 = vpop.f32.mrf.mxu0 }
 0x26b   :  { %v1563_v8 = vmax.f32 %v1312_v4, 0.0  ;;  %v1626_v12 = vpack.c.bf16 %v1565_v5, %v1564_v9  ;;  %v1333_v16 = vadd.f32 %v2497_v6, %v3100_v63 }
 0x26c   :  { %v1324_v10 = vpop.f32.mrf.mxu0 }
 0x26d   :  { %v1625_v11 = vpack.c.bf16 %v1563_v8, %v1562_v7  ;;  %v1325_v14 = vadd.f32 %v3100_v63, %v1324_v10  ;;  %v1568_v23 = vmax.f32 %v1333_v16, 0.0 }
 0x26e   :  { %v2498_v13 = vpop.f32.mrf.mxu0 }
 0x26f   :  { %v1336_v15 = vadd.f32 %v2498_v13, %v3100_v63  ;;  %2571 = vmatprep.mubr.bf16.mxu0 %v1625_v11  ;;  %v1566_v46 = vmax.f32 %v1325_v14, 0.0 }
 0x270   :  { %v1327_v17 = vpop.f32.mrf.mxu0  ;;  %2572 = vmatmul.mubr.bf16.vlgmr.msra.gmra.mxu0 %v1626_v12 }
 0x271   :  { %v1328_v18 = vadd.f32 %v3100_v63, %v1327_v17  ;;  %v1569_v19 = vmax.f32 %v1336_v15, 0.0 }
 0x272   :  { %v2501_v20 = vpop.f32.mrf.mxu0 }
 0x273   :  { %v1567_v21 = vmax.f32 %v1328_v18, 0.0  ;;  %v1628_v26 = vpack.c.bf16 %v1569_v19, %v1568_v23  ;;  %v1349_v30 = vadd.f32 %v2501_v20, %v3100_v63 }
 0x274   :  { %v1340_v24 = vpop.f32.mrf.mxu0 }
 0x275   :  { %v1627_v25 = vpack.c.bf16 %v1567_v21, %v1566_v46  ;;  %v1341_v28 = vadd.f32 %v3100_v63, %v1340_v24  ;;  %v1572_v37 = vmax.f32 %v1349_v30, 0.0 }
 0x276   :  { %v2502_v27 = vpop.f32.mrf.mxu0 }
 0x277   :  { %v1352_v29 = vadd.f32 %v2502_v27, %v3100_v63  ;;  %2575 = vmatprep.mubr.bf16.mxu1 %v1627_v25  ;;  %v1570_v35 = vmax.f32 %v1341_v28, 0.0 }
 0x278   :  { %v1343_v31 = vpop.f32.mrf.mxu0  ;;  %2576 = vmatmul.mubr.bf16.vlgmr.msra.gmra.mxu1 %v1628_v26 }
 0x279   :  { %v1344_v32 = vadd.f32 %v3100_v63, %v1343_v31  ;;  %v1573_v33 = vmax.f32 %v1352_v29, 0.0 }
 0x27a   :  { %v2505_v34 = vpop.f32.mrf.mxu0 }
 0x27b   :  { %v1571_v36 = vmax.f32 %v1344_v32, 0.0  ;;  %v1630_v40 = vpack.c.bf16 %v1573_v33, %v1572_v37  ;;  %v1365_v44 = vadd.f32 %v2505_v34, %v3100_v63 }
 0x27c   :  { %v1356_v38 = vpop.f32.mrf.mxu0 }
 0x27d   :  { %v1629_v39 = vpack.c.bf16 %v1571_v36, %v1570_v35  ;;  %v1357_v42 = vadd.f32 %v3100_v63, %v1356_v38  ;;  %v1576_v52 = vmax.f32 %v1365_v44, 0.0 }
 0x27e   :  { %v2506_v41 = vpop.f32.mrf.mxu0 }
 0x27f   :  { %v1368_v43 = vadd.f32 %v2506_v41, %v3100_v63  ;;  %2579 = vmatprep.mubr.bf16.mxu1 %v1629_v39  ;;  %v1574_v50 = vmax.f32 %v1357_v42, 0.0 }
 0x280   :  { %v1359_v45 = vpop.f32.mrf.mxu0  ;;  %2580 = vmatmul.mubr.bf16.gmra.mxu1 %v1630_v40 }
 0x281   :  { %v1360_v47 = vadd.f32 %v3100_v63, %v1359_v45  ;;  %v1577_v48 = vmax.f32 %v1368_v43, 0.0 }
 0x282   :  { %v2509_v49 = vpop.f32.mrf.mxu0 }
 0x283   :  { %v1575_v51 = vmax.f32 %v1360_v47, 0.0  ;;  %v1632_v55 = vpack.c.bf16 %v1577_v48, %v1576_v52  ;;  %v1381_v59 = vadd.f32 %v2509_v49, %v3100_v63 }
 0x284   :  { %v1372_v53 = vpop.f32.mrf.mxu0 }
 0x285   :  { %v1631_v54 = vpack.c.bf16 %v1575_v51, %v1574_v50  ;;  %v1373_v57 = vadd.f32 %v3100_v63, %v1372_v53  ;;  %v1580_v22 = vmax.f32 %v1381_v59, 0.0 }
 0x286   :  { %v2510_v56 = vpop.f32.mrf.mxu0 }
 0x287   :  { %v1384_v58 = vadd.f32 %v2510_v56, %v3100_v63  ;;  %2583 = vmatprep.mubr.bf16.mxu1 %v1631_v54  ;;  %v1578_v1 = vmax.f32 %v1373_v57, 0.0 }
 0x288   :  { %v1375_v60 = vpop.f32.mrf.mxu0  ;;  %2584 = vmatmul.mubr.bf16.gmra.mxu1 %v1632_v55 }
 0x289   :  { %v1376_v61 = vadd.f32 %v3100_v63, %v1375_v60  ;;  %v1581_v62 = vmax.f32 %v1384_v58, 0.0 }
 0x28a   :  { %v2513_v0 = vpop.f32.mrf.mxu0 }
 0x28b   :  { %v1579_v2 = vmax.f32 %v1376_v61, 0.0  ;;  %v1634_v5 = vpack.c.bf16 %v1581_v62, %v1580_v22  ;;  %v1397_v9 = vadd.f32 %v2513_v0, %v3100_v63 }
 0x28c   :  { %v1388_v3 = vpop.f32.mrf.mxu0 }
 0x28d   :  { %v1633_v4 = vpack.c.bf16 %v1579_v2, %v1578_v1  ;;  %v1389_v7 = vadd.f32 %v3100_v63, %v1388_v3  ;;  %v1584_v16 = vmax.f32 %v1397_v9, 0.0 }
 0x28e   :  { %v2514_v6 = vpop.f32.mrf.mxu0 }
 0x28f   :  { %v1400_v8 = vadd.f32 %v2514_v6, %v3100_v63  ;;  %2587 = vmatprep.mubr.bf16.mxu1 %v1633_v4  ;;  %v1582_v14 = vmax.f32 %v1389_v7, 0.0 }
 0x290   :  { %v1391_v10 = vpop.f32.mrf.mxu0  ;;  %2588 = vmatmul.mubr.bf16.gmra.mxu1 %v1634_v5 }
 0x291   :  { %v1392_v11 = vadd.f32 %v3100_v63, %v1391_v10  ;;  %v1585_v12 = vmax.f32 %v1400_v8, 0.0 }
 0x292   :  { %v2517_v13 = vpop.f32.mrf.mxu0 }
 0x293   :  { %v1583_v15 = vmax.f32 %v1392_v11, 0.0  ;;  %v1636_v19 = vpack.c.bf16 %v1585_v12, %v1584_v16  ;;  %v1413_v23 = vadd.f32 %v2517_v13, %v3100_v63 }
 0x294   :  { %v1404_v17 = vpop.f32.mrf.mxu0 }
 0x295   :  { %v1635_v18 = vpack.c.bf16 %v1583_v15, %v1582_v14  ;;  %v1405_v46 = vadd.f32 %v3100_v63, %v1404_v17  ;;  %v1588_v30 = vmax.f32 %v1413_v23, 0.0 }
 0x296   :  { %v2518_v20 = vpop.f32.mrf.mxu0 }
 0x297   :  { %v1416_v21 = vadd.f32 %v2518_v20, %v3100_v63  ;;  %2591 = vmatprep.mubr.bf16.mxu1 %v1635_v18  ;;  %v1586_v28 = vmax.f32 %v1405_v46, 0.0 }
 0x298   :  { %v1407_v24 = vpop.f32.mrf.mxu0  ;;  %2592 = vmatmul.mubr.bf16.gmra.mxu1 %v1636_v19 }
 0x299   :  { %v1408_v25 = vadd.f32 %v3100_v63, %v1407_v24  ;;  %v1589_v26 = vmax.f32 %v1416_v21, 0.0 }
 0x29a   :  { %v2521_v27 = vpop.f32.mrf.mxu0 }
 0x29b   :  { %v1587_v29 = vmax.f32 %v1408_v25, 0.0  ;;  %v1638_v33 = vpack.c.bf16 %v1589_v26, %v1588_v30  ;;  %v1429_v37 = vadd.f32 %v2521_v27, %v3100_v63 }
 0x29c   :  { %v1420_v31 = vpop.f32.mrf.mxu0 }
 0x29d   :  { %v1637_v32 = vpack.c.bf16 %v1587_v29, %v1586_v28  ;;  %v1421_v35 = vadd.f32 %v3100_v63, %v1420_v31  ;;  %v1592_v44 = vmax.f32 %v1429_v37, 0.0 }
 0x29e   :  { %v2522_v34 = vpop.f32.mrf.mxu0 }
 0x29f   :  { %v1432_v36 = vadd.f32 %v2522_v34, %v3100_v63  ;;  %2595 = vmatprep.mubr.bf16.mxu1 %v1637_v32  ;;  %v1590_v42 = vmax.f32 %v1421_v35, 0.0 }
 0x2a0   :  { %v1423_v38 = vpop.f32.mrf.mxu0  ;;  %2596 = vmatmul.mubr.bf16.gmra.mxu1 %v1638_v33 }
 0x2a1   :  { %v1424_v39 = vadd.f32 %v3100_v63, %v1423_v38  ;;  %v1593_v40 = vmax.f32 %v1432_v36, 0.0 }
 0x2a2   :  { %v2525_v41 = vpop.f32.mrf.mxu0 }
 0x2a3   :  { %v1591_v43 = vmax.f32 %v1424_v39, 0.0  ;;  %v1640_v48 = vpack.c.bf16 %v1593_v40, %v1592_v44  ;;  %v1445_v52 = vadd.f32 %v2525_v41, %v3100_v63 }
 0x2a4   :  { %v1436_v45 = vpop.f32.mrf.mxu0 }
 0x2a5   :  { %v1639_v47 = vpack.c.bf16 %v1591_v43, %v1590_v42  ;;  %v1437_v50 = vadd.f32 %v3100_v63, %v1436_v45  ;;  %v1596_v59 = vmax.f32 %v1445_v52, 0.0 }
 0x2a6   :  { %v2526_v49 = vpop.f32.mrf.mxu0 }
 0x2a7   :  { %v1448_v51 = vadd.f32 %v2526_v49, %v3100_v63  ;;  %2599 = vmatprep.mubr.bf16.mxu1 %v1639_v47  ;;  %v1594_v57 = vmax.f32 %v1437_v50, 0.0 }
 0x2a8   :  { %v1439_v53 = vpop.f32.mrf.mxu0  ;;  %2600 = vmatmul.mubr.bf16.gmra.mxu1 %v1640_v48 }
 0x2a9   :  { %v1440_v54 = vadd.f32 %v3100_v63, %v1439_v53  ;;  %v1597_v55 = vmax.f32 %v1448_v51, 0.0 }
 0x2aa   :  { %v2529_v56 = vpop.f32.mrf.mxu0 }
 0x2ab   :  { %v1595_v58 = vmax.f32 %v1440_v54, 0.0  ;;  %v1642_v62 = vpack.c.bf16 %v1597_v55, %v1596_v59  ;;  %v1461_v22 = vadd.f32 %v2529_v56, %v3100_v63 }
 0x2ac   :  { %v1452_v60 = vpop.f32.mrf.mxu0 }
 0x2ad   :  { %v1641_v61 = vpack.c.bf16 %v1595_v58, %v1594_v57  ;;  %v1453_v1 = vadd.f32 %v3100_v63, %v1452_v60  ;;  %v1600_v9 = vmax.f32 %v1461_v22, 0.0 }
 0x2ae   :  { %v2530_v0 = vpop.f32.mrf.mxu0 }
 0x2af   :  { %v1464_v2 = vadd.f32 %v2530_v0, %v3100_v63  ;;  %2603 = vmatprep.mubr.bf16.mxu1 %v1641_v61  ;;  %v1598_v7 = vmax.f32 %v1453_v1, 0.0 }
 0x2b0   :  { %v1455_v3 = vpop.f32.mrf.mxu0  ;;  %2604 = vmatmul.mubr.bf16.gmra.mxu1 %v1642_v62 }
 0x2b1   :  { %v1456_v4 = vadd.f32 %v3100_v63, %v1455_v3  ;;  %v1601_v5 = vmax.f32 %v1464_v2, 0.0 }
 0x2b2   :  { %v2533_v6 = vpop.f32.mrf.mxu0 }
 0x2b3   :  { %v1599_v8 = vmax.f32 %v1456_v4, 0.0  ;;  %v1644_v12 = vpack.c.bf16 %v1601_v5, %v1600_v9  ;;  %v1477_v16 = vadd.f32 %v2533_v6, %v3100_v63 }
 0x2b4   :  { %v1468_v10 = vpop.f32.mrf.mxu0 }
 0x2b5   :  { %v1643_v11 = vpack.c.bf16 %v1599_v8, %v1598_v7  ;;  %v1469_v14 = vadd.f32 %v3100_v63, %v1468_v10  ;;  %v1604_v23 = vmax.f32 %v1477_v16, 0.0 }
 0x2b6   :  { %v2534_v13 = vpop.f32.mrf.mxu0 }
 0x2b7   :  { %v1480_v15 = vadd.f32 %v2534_v13, %v3100_v63  ;;  %2607 = vmatprep.mubr.bf16.mxu1 %v1643_v11  ;;  %v1602_v46 = vmax.f32 %v1469_v14, 0.0 }
 0x2b8   :  { %v1471_v17 = vpop.f32.mrf.mxu0  ;;  %2608 = vmatmul.mubr.bf16.gmra.mxu1 %v1644_v12 }
 0x2b9   :  { %v1472_v18 = vadd.f32 %v3100_v63, %v1471_v17  ;;  %v1605_v19 = vmax.f32 %v1480_v15, 0.0 }
 0x2ba   :  { %v2537_v20 = vpop.f32.mrf.mxu0 }
 0x2bb   :  { %v1603_v21 = vmax.f32 %v1472_v18, 0.0  ;;  %v1646_v26 = vpack.c.bf16 %v1605_v19, %v1604_v23  ;;  %v1493_v30 = vadd.f32 %v2537_v20, %v3100_v63 }
 0x2bc   :  { %v1484_v24 = vpop.f32.mrf.mxu0 }
 0x2bd   :  { %v1645_v25 = vpack.c.bf16 %v1603_v21, %v1602_v46  ;;  %v1485_v28 = vadd.f32 %v3100_v63, %v1484_v24  ;;  %v1608_v37 = vmax.f32 %v1493_v30, 0.0  ;;  %v3168_v30 = vld [vmem:[%s3493_s8] ss:$0 sm:$0xff] }
 0x2be   :  { %v2538_v27 = vpop.f32.mrf.mxu0 }
 0x2bf   :  { %v1496_v29 = vadd.f32 %v2538_v27, %v3100_v63  ;;  %2611 = vmatprep.mubr.bf16.mxu1 %v1645_v25  ;;  %v1606_v35 = vmax.f32 %v1485_v28, 0.0 }
 0x2c0   :  { %v1487_v31 = vpop.f32.mrf.mxu0  ;;  %2612 = vmatmul.mubr.bf16.gmra.mxu1 %v1646_v26 }
 0x2c1   :  { %v1488_v32 = vadd.f32 %v3100_v63, %v1487_v31  ;;  %v1609_v33 = vmax.f32 %v1496_v29, 0.0 }
 0x2c2   :  { %v2541_v34 = vpop.f32.mrf.mxu0 }
 0x2c3   :  { %v1607_v36 = vmax.f32 %v1488_v32, 0.0  ;;  %v1648_v40 = vpack.c.bf16 %v1609_v33, %v1608_v37  ;;  %v1509_v44 = vadd.f32 %v2541_v34, %v3100_v63 }
 0x2c4   :  { %v1500_v38 = vpop.f32.mrf.mxu0 }
 0x2c5   :  { %v1647_v39 = vpack.c.bf16 %v1607_v36, %v1606_v35  ;;  %v1501_v42 = vadd.f32 %v3100_v63, %v1500_v38  ;;  %v1612_v52 = vmax.f32 %v1509_v44, 0.0 }
 0x2c6   :  { %v2542_v41 = vpop.f32.mrf.mxu0 }
 0x2c7   :  { %v1512_v43 = vadd.f32 %v2542_v41, %v3100_v63  ;;  %2615 = vmatprep.mubr.bf16.mxu1 %v1647_v39  ;;  %v1610_v50 = vmax.f32 %v1501_v42, 0.0 }
 0x2c8   :  { %v1503_v45 = vpop.f32.mrf.mxu0  ;;  %2616 = vmatmul.mubr.bf16.gmra.mxu1 %v1648_v40 }
 0x2c9   :  { %v1504_v47 = vadd.f32 %v3100_v63, %v1503_v45  ;;  %v1613_v48 = vmax.f32 %v1512_v43, 0.0 }
 0x2ca   :  { %v2545_v49 = vpop.f32.mrf.mxu0 }
 0x2cb   :  { %v1611_v51 = vmax.f32 %v1504_v47, 0.0  ;;  %v1650_v55 = vpack.c.bf16 %v1613_v48, %v1612_v52  ;;  %v1525_v59 = vadd.f32 %v2545_v49, %v3100_v63 }
 0x2cc   :  { %v1516_v53 = vpop.f32.mrf.mxu0 }
 0x2cd   :  { %v1649_v54 = vpack.c.bf16 %v1611_v51, %v1610_v50  ;;  %v1517_v57 = vadd.f32 %v3100_v63, %v1516_v53  ;;  %v1616_v22 = vmax.f32 %v1525_v59, 0.0 }
 0x2ce   :  { %v2546_v56 = vpop.f32.mrf.mxu0 }
 0x2cf   :  { %v1528_v58 = vadd.f32 %v2546_v56, %v3100_v63  ;;  %2619 = vmatprep.mubr.bf16.mxu1 %v1649_v54  ;;  %v1614_v1 = vmax.f32 %v1517_v57, 0.0 }
 0x2d0   :  { %v1519_v60 = vpop.f32.mrf.mxu0  ;;  %2620 = vmatmul.mubr.bf16.gmra.mxu1 %v1650_v55 }
 0x2d1   :  { %v1520_v61 = vadd.f32 %v3100_v63, %v1519_v60  ;;  %v1617_v62 = vmax.f32 %v1528_v58, 0.0 }
 0x2d2   :  { %v2549_v0 = vpop.f32.mrf.mxu0 }
 0x2d3   :  { %v1615_v2 = vmax.f32 %v1520_v61, 0.0  ;;  %v1652_v5 = vpack.c.bf16 %v1617_v62, %v1616_v22  ;;  %v1541_v9 = vadd.f32 %v2549_v0, %v3100_v63 }
 0x2d4   :  { %v1532_v3 = vpop.f32.mrf.mxu0 }
 0x2d5   :  { %v1651_v4 = vpack.c.bf16 %v1615_v2, %v1614_v1  ;;  %v1533_v7 = vadd.f32 %v3100_v63, %v1532_v3  ;;  %v1620_v16 = vmax.f32 %v1541_v9, 0.0 }
 0x2d6   :  { %v2550_v6 = vpop.f32.mrf.mxu0 }
 0x2d7   :  { %v1544_v8 = vadd.f32 %v2550_v6, %v3100_v63  ;;  %2623 = vmatprep.mubr.bf16.mxu1 %v1651_v4  ;;  %v1618_v14 = vmax.f32 %v1533_v7, 0.0 }
 0x2d8   :  { %v1535_v10 = vpop.f32.mrf.mxu0  ;;  %2624 = vmatmul.mubr.bf16.gmra.mxu1 %v1652_v5 }
 0x2d9   :  { %v1536_v11 = vadd.f32 %v3100_v63, %v1535_v10  ;;  %v1621_v12 = vmax.f32 %v1544_v8, 0.0 }
 0x2da   :  { %v2553_v13 = vpop.f32.mrf.mxu0 }
 0x2db   :  { %v1619_v15 = vmax.f32 %v1536_v11, 0.0  ;;  %v1654_v19 = vpack.c.bf16 %v1621_v12, %v1620_v16  ;;  %v1557_v20 = vadd.f32 %v2553_v13, %v3100_v63 }
 0x2dc   :  { %v1548_v17 = vpop.f32.mrf.mxu0 }
 0x2dd   :  { %v1653_v18 = vpack.c.bf16 %v1619_v15, %v1618_v14  ;;  %v1549_v21 = vadd.f32 %v3100_v63, %v1548_v17  ;;  %v1624_v25 = vmax.f32 %v1557_v20, 0.0 }
 0x2de   :  { %v2554_v46 = vpop.f32.mrf.mxu0 }
 0x2df   :  { %2627 = vmatprep.mubr.bf16.mxu1 %v1653_v18  ;;  %v1622_v26 = vmax.f32 %v1549_v21, 0.0  ;;  %v1656_v29 = vpack.c.bf16 %v1624_v25, %v1624_v25 }
 0x2e0   :  { %v1551_v23 = vpop.f32.mrf.mxu0  ;;  %2628 = vmatmul.mubr.bf16.gmra.mxu1 %v1654_v19 }
 0x2e1   :  { %v1552_v24 = vadd.f32 %v3100_v63, %v1551_v23 }
 0x2e3   :  { %v1623_v27 = vmax.f32 %v1552_v24, 0.0 }
 0x2e5   :  { %v1655_v28 = vpack.c.bf16 %v1623_v27, %v1622_v26 }
 0x2e7   :  { %2631 = vmatprep.mubr.bf16.mxu1 %v1655_v28 }
 0x2e8   :  { %2632 = vmatmul.mubr.bf16.gmra.mxu1 %v1656_v29 }
 0x330   :  { %v2573_v31 = vpop.f32.mrf.mxu0 }
 0x331   :  { %v1771_v32 = vadd.f32 %v2573_v31, %v3168_v30 }
 0x332   :  { %v1762_v33 = vpop.f32.mrf.mxu0 }
 0x333   :  { %2018 = vst.msk [vmem:[%s3494_s9 + $0x10] sm:$0xff] %vm269_vm0, %v1771_v32  ;;  %v1763_v63 = vadd.f32 %v3168_v30, %v1762_v33 }
 0x334   :  { %v2574_v34 = vpop.f32.mrf.mxu0 }
 0x335   :  { %2016 = vst.msk [vmem:[%s3494_s9] sm:$0xff] %vm269_vm0, %v1763_v63  ;;  %v1774_v35 = vadd.f32 %v2574_v34, %v3168_v30 }
 0x336   :  { %v1765_v36 = vpop.f32.mrf.mxu0 }
 0x337   :  { %2019 = vst.msk [vmem:[%s3494_s9 + $0x18] sm:$0xff] %vm269_vm0, %v1774_v35  ;;  %v1766_v37 = vadd.f32 %v3168_v30, %v1765_v36 }
 0x338   :  { %v2577_v38 = vpop.f32.mrf.mxu1 }
 0x339   :  { %2017 = vst.msk [vmem:[%s3494_s9 + $0x8] sm:$0xff] %vm269_vm0, %v1766_v37  ;;  %v1787_v39 = vadd.f32 %v2577_v38, %v3168_v30 }
 0x33a   :  { %v1778_v40 = vpop.f32.mrf.mxu1 }
 0x33b   :  { %2022 = vst.msk [vmem:[%s3494_s9 + $0x30] sm:$0xff] %vm269_vm0, %v1787_v39  ;;  %v1779_v41 = vadd.f32 %v3168_v30, %v1778_v40 }
 0x33c   :  { %v2578_v42 = vpop.f32.mrf.mxu1 }
 0x33d   :  { %2020 = vst.msk [vmem:[%s3494_s9 + $0x20] sm:$0xff] %vm269_vm0, %v1779_v41  ;;  %v1790_v43 = vadd.f32 %v2578_v42, %v3168_v30 }
 0x33e   :  { %v1781_v44 = vpop.f32.mrf.mxu1 }
 0x33f   :  { %2023 = vst.msk [vmem:[%s3494_s9 + $0x38] sm:$0xff] %vm269_vm0, %v1790_v43  ;;  %v1782_v45 = vadd.f32 %v3168_v30, %v1781_v44 }
 0x340   :  { %v2581_v47 = vpop.f32.mrf.mxu1 }
 0x341   :  { %2021 = vst.msk [vmem:[%s3494_s9 + $0x28] sm:$0xff] %vm269_vm0, %v1782_v45  ;;  %v1803_v48 = vadd.f32 %v2581_v47, %v3168_v30 }
 0x342   :  { %v1794_v49 = vpop.f32.mrf.mxu1 }
 0x343   :  { %2026 = vst.msk [vmem:[%s3494_s9 + $0x50] sm:$0xff] %vm269_vm0, %v1803_v48  ;;  %v1795_v50 = vadd.f32 %v3168_v30, %v1794_v49 }
 0x344   :  { %v2582_v51 = vpop.f32.mrf.mxu1 }
 0x345   :  { %2024 = vst.msk [vmem:[%s3494_s9 + $0x40] sm:$0xff] %vm269_vm0, %v1795_v50  ;;  %v1806_v52 = vadd.f32 %v2582_v51, %v3168_v30 }
 0x346   :  { %v1797_v53 = vpop.f32.mrf.mxu1 }
 0x347   :  { %2027 = vst.msk [vmem:[%s3494_s9 + $0x58] sm:$0xff] %vm269_vm0, %v1806_v52  ;;  %v1798_v54 = vadd.f32 %v3168_v30, %v1797_v53 }
 0x348   :  { %v2585_v55 = vpop.f32.mrf.mxu1 }
 0x349   :  { %2025 = vst.msk [vmem:[%s3494_s9 + $0x48] sm:$0xff] %vm269_vm0, %v1798_v54  ;;  %v1819_v56 = vadd.f32 %v2585_v55, %v3168_v30 }
 0x34a   :  { %v1810_v57 = vpop.f32.mrf.mxu1 }
 0x34b   :  { %2030 = vst.msk [vmem:[%s3494_s9 + $0x70] sm:$0xff] %vm269_vm0, %v1819_v56  ;;  %v1811_v58 = vadd.f32 %v3168_v30, %v1810_v57 }
 0x34c   :  { %v2586_v59 = vpop.f32.mrf.mxu1 }
 0x34d   :  { %2028 = vst.msk [vmem:[%s3494_s9 + $0x60] sm:$0xff] %vm269_vm0, %v1811_v58  ;;  %v1822_v60 = vadd.f32 %v2586_v59, %v3168_v30 }
 0x34e   :  { %v1813_v61 = vpop.f32.mrf.mxu1 }
 0x34f   :  { %2031 = vst.msk [vmem:[%s3494_s9 + $0x78] sm:$0xff] %vm269_vm0, %v1822_v60  ;;  %v1814_v62 = vadd.f32 %v3168_v30, %v1813_v61 }
 0x350   :  { %v2589_v0 = vpop.f32.mrf.mxu1 }
 0x351   :  { %2029 = vst.msk [vmem:[%s3494_s9 + $0x68] sm:$0xff] %vm269_vm0, %v1814_v62  ;;  %v1835_v1 = vadd.f32 %v2589_v0, %v3168_v30 }
 0x352   :  { %v1826_v2 = vpop.f32.mrf.mxu1 }
 0x353   :  { %2034 = vst.msk [vmem:[%s3494_s9 + $0x90] sm:$0xff] %vm269_vm0, %v1835_v1  ;;  %v1827_v22 = vadd.f32 %v3168_v30, %v1826_v2 }
 0x354   :  { %v2590_v3 = vpop.f32.mrf.mxu1 }
 0x355   :  { %2032 = vst.msk [vmem:[%s3494_s9 + $0x80] sm:$0xff] %vm269_vm0, %v1827_v22  ;;  %v1838_v4 = vadd.f32 %v2590_v3, %v3168_v30 }
 0x356   :  { %v1829_v5 = vpop.f32.mrf.mxu1 }
 0x357   :  { %2035 = vst.msk [vmem:[%s3494_s9 + $0x98] sm:$0xff] %vm269_vm0, %v1838_v4  ;;  %v1830_v6 = vadd.f32 %v3168_v30, %v1829_v5 }
 0x358   :  { %v2593_v7 = vpop.f32.mrf.mxu1 }
 0x359   :  { %2033 = vst.msk [vmem:[%s3494_s9 + $0x88] sm:$0xff] %vm269_vm0, %v1830_v6  ;;  %v1851_v8 = vadd.f32 %v2593_v7, %v3168_v30 }
 0x35a   :  { %v1842_v9 = vpop.f32.mrf.mxu1 }
 0x35b   :  { %2038 = vst.msk [vmem:[%s3494_s9 + $0xb0] sm:$0xff] %vm269_vm0, %v1851_v8  ;;  %v1843_v10 = vadd.f32 %v3168_v30, %v1842_v9 }
 0x35c   :  { %v2594_v11 = vpop.f32.mrf.mxu1 }
 0x35d   :  { %2036 = vst.msk [vmem:[%s3494_s9 + $0xa0] sm:$0xff] %vm269_vm0, %v1843_v10  ;;  %v1854_v12 = vadd.f32 %v2594_v11, %v3168_v30 }
 0x35e   :  { %v1845_v13 = vpop.f32.mrf.mxu1 }
 0x35f   :  { %2039 = vst.msk [vmem:[%s3494_s9 + $0xb8] sm:$0xff] %vm269_vm0, %v1854_v12  ;;  %v1846_v14 = vadd.f32 %v3168_v30, %v1845_v13 }
 0x360   :  { %v2597_v15 = vpop.f32.mrf.mxu1 }
 0x361   :  { %2037 = vst.msk [vmem:[%s3494_s9 + $0xa8] sm:$0xff] %vm269_vm0, %v1846_v14  ;;  %v1867_v16 = vadd.f32 %v2597_v15, %v3168_v30 }
 0x362   :  { %v1858_v17 = vpop.f32.mrf.mxu1 }
 0x363   :  { %2042 = vst.msk [vmem:[%s3494_s9 + $0xd0] sm:$0xff] %vm269_vm0, %v1867_v16  ;;  %v1859_v18 = vadd.f32 %v3168_v30, %v1858_v17 }
 0x364   :  { %v2598_v19 = vpop.f32.mrf.mxu1 }
 0x365   :  { %2040 = vst.msk [vmem:[%s3494_s9 + $0xc0] sm:$0xff] %vm269_vm0, %v1859_v18  ;;  %v1870_v20 = vadd.f32 %v2598_v19, %v3168_v30 }
 0x366   :  { %v1861_v46 = vpop.f32.mrf.mxu1 }
 0x367   :  { %2043 = vst.msk [vmem:[%s3494_s9 + $0xd8] sm:$0xff] %vm269_vm0, %v1870_v20  ;;  %v1862_v21 = vadd.f32 %v3168_v30, %v1861_v46 }
 0x368   :  { %v2601_v23 = vpop.f32.mrf.mxu1 }
 0x369   :  { %2041 = vst.msk [vmem:[%s3494_s9 + $0xc8] sm:$0xff] %vm269_vm0, %v1862_v21  ;;  %v1883_v24 = vadd.f32 %v2601_v23, %v3168_v30 }
 0x36a   :  { %v1874_v25 = vpop.f32.mrf.mxu1 }
 0x36b   :  { %2046 = vst.msk [vmem:[%s3494_s9 + $0xf0] sm:$0xff] %vm269_vm0, %v1883_v24  ;;  %v1875_v26 = vadd.f32 %v3168_v30, %v1874_v25 }
 0x36c   :  { %v2602_v27 = vpop.f32.mrf.mxu1 }
 0x36d   :  { %2044 = vst.msk [vmem:[%s3494_s9 + $0xe0] sm:$0xff] %vm269_vm0, %v1875_v26  ;;  %v1886_v28 = vadd.f32 %v2602_v27, %v3168_v30 }
 0x36e   :  { %v1877_v29 = vpop.f32.mrf.mxu1 }
 0x36f   :  { %2047 = vst.msk [vmem:[%s3494_s9 + $0xf8] sm:$0xff] %vm269_vm0, %v1886_v28  ;;  %v1878_v31 = vadd.f32 %v3168_v30, %v1877_v29 }
 0x370   :  { %v2605_v32 = vpop.f32.mrf.mxu1 }
 0x371   :  { %2045 = vst.msk [vmem:[%s3494_s9 + $0xe8] sm:$0xff] %vm269_vm0, %v1878_v31  ;;  %v1899_v33 = vadd.f32 %v2605_v32, %v3168_v30 }
 0x372   :  { %v1890_v63 = vpop.f32.mrf.mxu1 }
 0x373   :  { %2050 = vst.msk [vmem:[%s3494_s9 + $0x110] sm:$0xff] %vm269_vm0, %v1899_v33  ;;  %v1891_v34 = vadd.f32 %v3168_v30, %v1890_v63 }
 0x374   :  { %v2606_v35 = vpop.f32.mrf.mxu1 }
 0x375   :  { %2048 = vst.msk [vmem:[%s3494_s9 + $0x100] sm:$0xff] %vm269_vm0, %v1891_v34  ;;  %v1902_v36 = vadd.f32 %v2606_v35, %v3168_v30 }
 0x376   :  { %v1893_v37 = vpop.f32.mrf.mxu1 }
 0x377   :  { %2051 = vst.msk [vmem:[%s3494_s9 + $0x118] sm:$0xff] %vm269_vm0, %v1902_v36  ;;  %v1894_v38 = vadd.f32 %v3168_v30, %v1893_v37 }
 0x378   :  { %v2609_v39 = vpop.f32.mrf.mxu1 }
 0x379   :  { %2049 = vst.msk [vmem:[%s3494_s9 + $0x108] sm:$0xff] %vm269_vm0, %v1894_v38  ;;  %v1915_v40 = vadd.f32 %v2609_v39, %v3168_v30 }
 0x37a   :  { %v1906_v41 = vpop.f32.mrf.mxu1 }
 0x37b   :  { %2054 = vst.msk [vmem:[%s3494_s9 + $0x130] sm:$0xff] %vm269_vm0, %v1915_v40  ;;  %v1907_v42 = vadd.f32 %v3168_v30, %v1906_v41 }
 0x37c   :  { %v2610_v43 = vpop.f32.mrf.mxu1 }
 0x37d   :  { %2052 = vst.msk [vmem:[%s3494_s9 + $0x120] sm:$0xff] %vm269_vm0, %v1907_v42  ;;  %v1918_v44 = vadd.f32 %v2610_v43, %v3168_v30 }
 0x37e   :  { %v1909_v45 = vpop.f32.mrf.mxu1 }
 0x37f   :  { %2055 = vst.msk [vmem:[%s3494_s9 + $0x138] sm:$0xff] %vm269_vm0, %v1918_v44  ;;  %v1910_v47 = vadd.f32 %v3168_v30, %v1909_v45 }
 0x380   :  { %v2613_v48 = vpop.f32.mrf.mxu1 }
 0x381   :  { %2053 = vst.msk [vmem:[%s3494_s9 + $0x128] sm:$0xff] %vm269_vm0, %v1910_v47  ;;  %v1931_v49 = vadd.f32 %v2613_v48, %v3168_v30 }
 0x382   :  { %v1922_v50 = vpop.f32.mrf.mxu1 }
 0x383   :  { %2058 = vst.msk [vmem:[%s3494_s9 + $0x150] sm:$0xff] %vm269_vm0, %v1931_v49  ;;  %v1923_v51 = vadd.f32 %v3168_v30, %v1922_v50 }
 0x384   :  { %v2614_v52 = vpop.f32.mrf.mxu1 }
 0x385   :  { %2056 = vst.msk [vmem:[%s3494_s9 + $0x140] sm:$0xff] %vm269_vm0, %v1923_v51  ;;  %v1934_v53 = vadd.f32 %v2614_v52, %v3168_v30 }
 0x386   :  { %v1925_v54 = vpop.f32.mrf.mxu1 }
 0x387   :  { %2059 = vst.msk [vmem:[%s3494_s9 + $0x158] sm:$0xff] %vm269_vm0, %v1934_v53  ;;  %v1926_v55 = vadd.f32 %v3168_v30, %v1925_v54 }
 0x388   :  { %v2617_v56 = vpop.f32.mrf.mxu1 }
 0x389   :  { %2057 = vst.msk [vmem:[%s3494_s9 + $0x148] sm:$0xff] %vm269_vm0, %v1926_v55  ;;  %v1947_v57 = vadd.f32 %v2617_v56, %v3168_v30 }
 0x38a   :  { %v1938_v58 = vpop.f32.mrf.mxu1 }
 0x38b   :  { %2062 = vst.msk [vmem:[%s3494_s9 + $0x170] sm:$0xff] %vm269_vm0, %v1947_v57  ;;  %v1939_v59 = vadd.f32 %v3168_v30, %v1938_v58 }
 0x38c   :  { %v2618_v60 = vpop.f32.mrf.mxu1 }
 0x38d   :  { %2060 = vst.msk [vmem:[%s3494_s9 + $0x160] sm:$0xff] %vm269_vm0, %v1939_v59  ;;  %v1950_v61 = vadd.f32 %v2618_v60, %v3168_v30 }
 0x38e   :  { %v1941_v62 = vpop.f32.mrf.mxu1 }
 0x38f   :  { %2063 = vst.msk [vmem:[%s3494_s9 + $0x178] sm:$0xff] %vm269_vm0, %v1950_v61  ;;  %v1942_v0 = vadd.f32 %v3168_v30, %v1941_v62 }
 0x390   :  { %v2621_v1 = vpop.f32.mrf.mxu1 }
 0x391   :  { %2061 = vst.msk [vmem:[%s3494_s9 + $0x168] sm:$0xff] %vm269_vm0, %v1942_v0  ;;  %v1963_v2 = vadd.f32 %v2621_v1, %v3168_v30 }
 0x392   :  { %v1954_v22 = vpop.f32.mrf.mxu1 }
 0x393   :  { %2066 = vst.msk [vmem:[%s3494_s9 + $0x190] sm:$0xff] %vm269_vm0, %v1963_v2  ;;  %v1955_v3 = vadd.f32 %v3168_v30, %v1954_v22 }
 0x394   :  { %v2622_v4 = vpop.f32.mrf.mxu1 }
 0x395   :  { %2064 = vst.msk [vmem:[%s3494_s9 + $0x180] sm:$0xff] %vm269_vm0, %v1955_v3  ;;  %v1966_v5 = vadd.f32 %v2622_v4, %v3168_v30 }
 0x396   :  { %v1957_v6 = vpop.f32.mrf.mxu1 }
 0x397   :  { %2067 = vst.msk [vmem:[%s3494_s9 + $0x198] sm:$0xff] %vm269_vm0, %v1966_v5  ;;  %v1958_v7 = vadd.f32 %v3168_v30, %v1957_v6 }
 0x398   :  { %v2625_v8 = vpop.f32.mrf.mxu1 }
 0x399   :  { %2065 = vst.msk [vmem:[%s3494_s9 + $0x188] sm:$0xff] %vm269_vm0, %v1958_v7  ;;  %v1979_v9 = vadd.f32 %v2625_v8, %v3168_v30 }
 0x39a   :  { %v1970_v10 = vpop.f32.mrf.mxu1 }
 0x39b   :  { %2070 = vst.msk [vmem:[%s3494_s9 + $0x1b0] sm:$0xff] %vm269_vm0, %v1979_v9  ;;  %v1971_v11 = vadd.f32 %v3168_v30, %v1970_v10 }
 0x39c   :  { %v2626_v12 = vpop.f32.mrf.mxu1 }
 0x39d   :  { %2068 = vst.msk [vmem:[%s3494_s9 + $0x1a0] sm:$0xff] %vm269_vm0, %v1971_v11  ;;  %v1982_v13 = vadd.f32 %v2626_v12, %v3168_v30 }
 0x39e   :  { %v1973_v14 = vpop.f32.mrf.mxu1 }
 0x39f   :  { %2071 = vst.msk [vmem:[%s3494_s9 + $0x1b8] sm:$0xff] %vm269_vm0, %v1982_v13  ;;  %v1974_v15 = vadd.f32 %v3168_v30, %v1973_v14 }
 0x3a0   :  { %v2629_v16 = vpop.f32.mrf.mxu1 }
 0x3a1   :  { %2069 = vst.msk [vmem:[%s3494_s9 + $0x1a8] sm:$0xff] %vm269_vm0, %v1974_v15  ;;  %v1995_v17 = vadd.f32 %v2629_v16, %v3168_v30 }
 0x3a2   :  { %v1986_v18 = vpop.f32.mrf.mxu1 }
 0x3a3   :  { %2074 = vst.msk [vmem:[%s3494_s9 + $0x1d0] sm:$0xff] %vm269_vm0, %v1995_v17  ;;  %v1987_v19 = vadd.f32 %v3168_v30, %v1986_v18 }
 0x3a4   :  { %v2630_v20 = vpop.f32.mrf.mxu1 }
 0x3a5   :  { %2072 = vst.msk [vmem:[%s3494_s9 + $0x1c0] sm:$0xff] %vm269_vm0, %v1987_v19  ;;  %v1998_v46 = vadd.f32 %v2630_v20, %v3168_v30 }
 0x3a6   :  { %v1989_v21 = vpop.f32.mrf.mxu1 }
 0x3a7   :  { %2075 = vst.msk [vmem:[%s3494_s9 + $0x1d8] sm:$0xff] %vm269_vm0, %v1998_v46  ;;  %v1990_v23 = vadd.f32 %v3168_v30, %v1989_v21 }
 0x3a8   :  { %v2633_v24 = vpop.f32.mrf.mxu1 }
 0x3a9   :  { %2073 = vst.msk [vmem:[%s3494_s9 + $0x1c8] sm:$0xff] %vm269_vm0, %v1990_v23  ;;  %v2011_v25 = vadd.f32 %v2633_v24, %v3168_v30 }
 0x3aa   :  { %v2002_v26 = vpop.f32.mrf.mxu1 }
 0x3ab   :  { %2078 = vst.msk [vmem:[%s3494_s9 + $0x1f0] sm:$0xff] %vm269_vm0, %v2011_v25  ;;  %v2003_v27 = vadd.f32 %v3168_v30, %v2002_v26 }
 0x3ac   :  { %v2634_v28 = vpop.f32.mrf.mxu1 }
 0x3ad   :  { %2076 = vst.msk [vmem:[%s3494_s9 + $0x1e0] sm:$0xff] %vm269_vm0, %v2003_v27 }
 0x3ae   :  { %v2005_v29 = vpop.f32.mrf.mxu1 }
 0x3af   :  { %v2006_v31 = vadd.f32 %v3168_v30, %v2005_v29 }
 0x3b1   :  { %2077 = vst.msk [vmem:[%s3494_s9 + $0x1e8] sm:$0xff] %vm269_vm0, %v2006_v31 }

</bundles_post_ra>
